<compile_context>
chip_gen: v7x
topology: tpu7x:2x2x1
jax: 0.10.0
libtpu: 0.0.40
codegen_flags: <defaults>
</compile_context>

<pallas_src>
import math
from functools import partial

import jax
import jax.numpy as jnp
from jax.experimental import pallas as pl
from jax.experimental.pallas import tpu as pltpu


def _round_up(x, m):
    return (x + m - 1) // m * m


def _pick_row_tile(h, target):
    t = min(target, h)
    while h % t:
        t -= 1
    return t


_COMPILER_PARAMS = pltpu.CompilerParams(
    dimension_semantics=("parallel", "parallel", "arbitrary"),
    vmem_limit_bytes=48 * 1024 * 1024,   # explicit budget; safe on v7x's 64 MiB
)


# -----------------------------------------------------------------------------
# Pallas kernels
# -----------------------------------------------------------------------------
def conv3x3_kernel(x_ref, w_ref, b_ref, o_ref, *, w_out, relu):
    # x_ref: (TH, Wp, 3*Cin) bf16 -- 3 ky-shifted, zero-padded input row bands
    #                                concatenated along channels.
    # w_ref: (3*Cin, 3*TC)  bf16 -- [ky*Cin+ci, kx*TC+co] = W3x3[ky, kx, ci, co]
    # b_ref: (1, TC) f32
    # o_ref: (TH, W, TC)
    th, wp, cin3 = x_ref.shape
    tc = o_ref.shape[-1]
    n_rows = th * wp

    # Layout no-op collapse (wp is a multiple of the sublane tile).
    xf = x_ref[...].reshape(n_rows, cin3)
    # One MXU matmul per tile: K = 3*Cin, N = 3*TC, f32 accumulation.
    y = jnp.dot(xf, w_ref[...], preferred_element_type=jnp.float32)

    # Combine the 3 kx taps: output pixel p needs y[p + kx, kx-th column chunk].
    # The circular wrap of the roll only pollutes the padded columns (w >= W),
    # which are sliced away below.
    acc = y[:, :tc]
    for kx in (1, 2):
        acc = acc + pltpu.roll(y[:, kx * tc:(kx + 1) * tc], n_rows - kx, 0)

    acc = acc + b_ref[...]
    if relu:
        acc = jnp.maximum(acc, 0.0)
    out = acc.reshape(th, wp, tc)[:, :w_out, :]
    o_ref[...] = out.astype(o_ref.dtype)


def conv1x1_add_kernel(x_ref, w_ref, b_ref, s_ref, o_ref, *, compute_dtype):
    # x_ref: (TH, W, Cin) f32, w_ref: (Cin, TC) bf16, b_ref: (1, TC) f32,
    # s_ref: (TH, W, TC) f32 (nearest-upsampled coarser level), o_ref: (TH, W, TC)
    th, wd, cin = x_ref.shape
    tc = o_ref.shape[-1]
    xf = x_ref[...].reshape(th * wd, cin).astype(compute_dtype)
    y = jnp.dot(xf, w_ref[...], preferred_element_type=jnp.float32) + b_ref[...]
    o_ref[...] = (y.reshape(th, wd, tc) + s_ref[...]).astype(o_ref.dtype)


# -----------------------------------------------------------------------------
# Wrappers
# -----------------------------------------------------------------------------
def conv3x3(x, w, b, relu, *, block_rows=8, block_cout=128,
            compute_dtype=jnp.bfloat16):
    """3x3 conv, stride 1, SAME padding, + bias (+ optional ReLU).  NHWC / HWIO."""
    N, H, W, Cin = x.shape
    Cout = w.shape[-1]
    th = _pick_row_tile(H, block_rows)
    tc = block_cout if Cout % block_cout == 0 else Cout
    n_ct = Cout // tc
    # Sublane-tile alignment for the compute dtype (8 for f32, 16 for bf16) so
    # in-kernel reshapes are layout no-ops.
    row_align = 8 * (4 // jnp.dtype(compute_dtype).itemsize)
    wp = _round_up(W + 2, row_align)

    # Zero-pad (1 row top/bottom, 1 col left, wp-W-1 cols right) and concatenate
    # the three ky-shifted views along channels -> (N, H, wp, 3*Cin) in bf16.
    # (bf16 keeps this staging tensor ~the same HBM bytes as one f32 pass.)
    xp = jnp.pad(x, ((0, 0), (1, 1), (1, wp - W - 1), (0, 0)))
    xs = jnp.concatenate([xp[:, ky:ky + H] for ky in range(3)],
                         axis=-1).astype(compute_dtype)

    # Weights -> (n_ct, 3*Cin, 3*tc) with layout [ct, ky*Cin+ci, kx*tc+j].
    wr = w.reshape(3, 3, Cin, n_ct, tc).transpose(3, 0, 2, 1, 4)
    wr = wr.reshape(n_ct, 3 * Cin, 3 * tc).astype(compute_dtype)
    b2 = b.reshape(1, Cout).astype(jnp.float32)

    kernel = partial(conv3x3_kernel, w_out=W, relu=relu)
    return pl.pallas_call(
        kernel,
        out_shape=jax.ShapeDtypeStruct((N, H, W, Cout), x.dtype),
        grid=(N, H // th, n_ct),
        in_specs=[
            pl.BlockSpec((None, th, wp, 3 * Cin), lambda n, r, c: (n, r, 0, 0)),
            pl.BlockSpec((None, 3 * Cin, 3 * tc), lambda n, r, c: (c, 0, 0)),
            pl.BlockSpec((1, tc), lambda n, r, c: (0, c)),
        ],
        out_specs=pl.BlockSpec((None, th, W, tc), lambda n, r, c: (n, r, 0, c)),
        compiler_params=_COMPILER_PARAMS,
    )(xs, wr, b2)


def conv1x1_add(x, w, b, skip, *, block_rows=8, block_cout=128,
                compute_dtype=jnp.bfloat16):
    """1x1 lateral conv + bias, fused with the FPN skip addition."""
    N, H, W, Cin = x.shape
    Cout = w.shape[-1]
    th = _pick_row_tile(H, block_rows)
    tc = block_cout if Cout % block_cout == 0 else Cout
    n_ct = Cout // tc
    kernel = partial(conv1x1_add_kernel, compute_dtype=compute_dtype)
    return pl.pallas_call(
        kernel,
        out_shape=jax.ShapeDtypeStruct((N, H, W, Cout), skip.dtype),
        grid=(N, H // th, n_ct),
        in_specs=[
            pl.BlockSpec((None, th, W, Cin), lambda n, r, c: (n, r, 0, 0)),
            pl.BlockSpec((Cin, tc), lambda n, r, c: (0, c)),
            pl.BlockSpec((1, tc), lambda n, r, c: (0, c)),
            pl.BlockSpec((None, th, W, tc), lambda n, r, c: (n, r, 0, c)),
        ],
        out_specs=pl.BlockSpec((None, th, W, tc), lambda n, r, c: (n, r, 0, c)),
        compiler_params=_COMPILER_PARAMS,
    )(x, w.astype(compute_dtype), b.reshape(1, Cout).astype(jnp.float32), skip)


def nearest_upsample(x, out_h, out_w):
    # PyTorch F.interpolate(mode="nearest"): src = floor(dst * in / out)
    N, H, W, C = x.shape
    ih = (jnp.arange(out_h) * H) // out_h
    iw = (jnp.arange(out_w) * W) // out_w
    return x[:, ih][:, :, iw]


# -----------------------------------------------------------------------------
# BasePixelDecoder parameters + forward_features
# -----------------------------------------------------------------------------
def c2_xavier(key, kh, kw, cin, cout):
    # caffe2 XavierFill == kaiming_uniform_(a=1): U(-sqrt(3/fan_in), sqrt(3/fan_in))
    fan_in = cin * kh * kw
    bound = math.sqrt(3.0 / fan_in)
    kw_, kb_ = jax.random.split(key)
    w = jax.random.uniform(kw_, (kh, kw, cin, cout), jnp.float32, -bound, bound)
    # c2_xavier_fill zeroes biases; small random biases exercise the bias path.
    b = jax.random.uniform(kb_, (cout,), jnp.float32, -0.1, 0.1)
    return w, b


def init_base_pixel_decoder(key, feature_channels, conv_dim, mask_dim):
    keys = jax.random.split(key, 2 * len(feature_channels) + 1)
    params = {"lateral": [], "output": []}
    ki = 0
    for idx, cin in enumerate(feature_channels):
        if idx == len(feature_channels) - 1:
            params["lateral"].append(None)
            params["output"].append(c2_xavier(keys[ki], 3, 3, cin, conv_dim)); ki += 1
        else:
            lw, lb = c2_xavier(keys[ki], 1, 1, cin, conv_dim); ki += 1
            params["lateral"].append((lw[0, 0], lb))          # (Cin, Cout) for 1x1
            params["output"].append(c2_xavier(keys[ki], 3, 3, conv_dim, conv_dim)); ki += 1
    params["mask_features"] = c2_xavier(keys[ki], 3, 3, conv_dim, mask_dim)
    # Stored low->high stride; forward iterates in reverse like the reference.
    params["lateral"] = params["lateral"][::-1]
    params["output"] = params["output"][::-1]
    return params


def forward_features(params, features, in_features, num_feature_levels=3):
    """features: dict name -> NHWC array.  Returns (mask_features, None, ms_feats)."""
    multi_scale_features = []
    num_cur_levels = 0
    y = None
    for idx, f in enumerate(in_features[::-1]):     # coarsest (largest stride) first
        x = features[f]
        lat = params["lateral"][idx]
        ow, ob = params["output"][idx]
        if lat is None:
            y = conv3x3(x, ow, ob, relu=True)
        else:
            lw, lb = lat
            up = nearest_upsample(y, x.shape[1], x.shape[2])
            y = conv1x1_add(x, lw, lb, up)          # cur_fpn + interpolate(y)
            y = conv3x3(y, ow, ob, relu=True)
        if num_cur_levels < num_feature_levels:
            multi_scale_features.append(y)
            num_cur_levels += 1
    mw, mb = params["mask_features"]
    mask = conv3x3(y, mw, mb, relu=False)
    return mask, None, multi_scale_features


# -----------------------------------------------------------------------------
# Pure-JAX reference (for correctness check); same bf16 operands / f32 accum.
# -----------------------------------------------------------------------------
def ref_conv(x, w, b, relu, pad, compute_dtype=jnp.bfloat16):
    y = jax.lax.conv_general_dilated(
        x.astype(compute_dtype), w.astype(compute_dtype), (1, 1),
        [(pad, pad), (pad, pad)],
        dimension_numbers=("NHWC", "HWIO", "NHWC"),
        preferred_element_type=jnp.float32)
    y = y + b
    return jnp.maximum(y, 0.0) if relu else y


def ref_forward(params, features, in_features, num_feature_levels=3):
    ms, n = [], 0
    y = None
    for idx, f in enumerate(in_features[::-1]):
        x = features[f]
        lat = params["lateral"][idx]
        ow, ob = params["output"][idx]
        if lat is None:
            y = ref_conv(x, ow, ob, True, 1)
        else:
            lw, lb = lat
            up = nearest_upsample(y, x.shape[1], x.shape[2])
            cur = ref_conv(x, lw.reshape(1, 1, *lw.shape), lb, False, 0)
            y = ref_conv(cur + up, ow, ob, True, 1)
        if n < num_feature_levels:
            ms.append(y); n += 1
    mw, mb = params["mask_features"]
    return ref_conv(y, mw, mb, False, 1), None, ms


# -----------------------------------------------------------------------------
if __name__ == "__main__":
    key = jax.random.PRNGKey(0)
    k_feat, k_param = jax.random.split(key)

    # Small synthetic pyramid (sorted by stride): res3/s8, res4/s16, res5/s32.
    # conv_dim / mask_dim are multiples of 128 so every output store is
    # lane-dense, and conv_dim=256 exercises the Cout-tiling grid axis.
    N, conv_dim, mask_dim = 2, 256, 128
    in_features = ["res3", "res4", "res5"]
    feat_specs = {"res3": (64, 16, 16), "res4": (128, 8, 8), "res5": (256, 4, 4)}
    fkeys = jax.random.split(k_feat, len(in_features))
    features = {
        name: jax.random.normal(
            fkeys[i],
            (N, feat_specs[name][1], feat_specs[name][2], feat_specs[name][0]),
            jnp.float32)
        for i, name in enumerate(in_features)
    }

    params = init_base_pixel_decoder(
        k_param, [feat_specs[n][0] for n in in_features], conv_dim, mask_dim)

    mask, _, ms_feats = forward_features(params, features, in_features)
    mask = jax.block_until_ready(mask)
    ms_feats = [jax.block_until_ready(m) for m in ms_feats]

    # Correctness check against a pure-JAX (XLA conv) reference.
    mask_ref, _, ms_ref = ref_forward(params, features, in_features)
    assert mask.shape == (N, 16, 16, mask_dim)
    assert [m.shape for m in ms_feats] == [(N, 4, 4, conv_dim),
                                           (N, 8, 8, conv_dim),
                                           (N, 16, 16, conv_dim)]
    assert jnp.allclose(mask, mask_ref, rtol=1e-2, atol=1e-2), \
        float(jnp.max(jnp.abs(mask - mask_ref)))
    for a, r in zip(ms_feats, ms_ref):
        assert jnp.allclose(a, r, rtol=1e-2, atol=1e-2)

    print("KERNEL_OK")
</pallas_src>

<mosaic_0001>
module attributes {stable_mosaic.version = 11 : i64} {
  func.func @conv3x3_kernel(%arg0: i32, %arg1: i32, %arg2: i32, %arg3: memref<1x4x16x768xbf16, #tpu.memory_space<vmem>>, %arg4: memref<1x768x384xbf16, #tpu.memory_space<vmem>>, %arg5: memref<1x128xf32, #tpu.memory_space<vmem>>, %arg6: memref<1x4x4x128xf32, #tpu.memory_space<vmem>>) attributes {dimension_semantics = [#tpu.dimension_semantics<parallel>, #tpu.dimension_semantics<parallel>, #tpu.dimension_semantics<arbitrary>], iteration_bounds = array<i64: 2, 1, 2>, scalar_prefetch = 0 : i64, scratch_operands = 0 : i64, tpu.core_type = #tpu.core_type<tc>, window_params = [{transform_indices = @transform_0, window_bounds = array<i64: 1, 4, 16, 768>}, {transform_indices = @transform_1, window_bounds = array<i64: 1, 768, 384>}, {transform_indices = @transform_2, window_bounds = array<i64: 1, 128>}, {transform_indices = @transform_3, window_bounds = array<i64: 1, 4, 4, 128>}]} {
    %c0 = arith.constant 0 : index
    %c0_0 = arith.constant 0 : index
    %c0_1 = arith.constant 0 : index
    %c0_2 = arith.constant 0 : index
    %0 = vector.load %arg3[%c0, %c0_0, %c0_1, %c0_2] : memref<1x4x16x768xbf16, #tpu.memory_space<vmem>>, vector<1x4x16x768xbf16>
    %1 = vector.shape_cast %0 : vector<1x4x16x768xbf16> to vector<4x16x768xbf16>
    %2 = vector.shape_cast %1 : vector<4x16x768xbf16> to vector<64x768xbf16>
    %c0_3 = arith.constant 0 : index
    %c0_4 = arith.constant 0 : index
    %c0_5 = arith.constant 0 : index
    %3 = vector.load %arg4[%c0_3, %c0_4, %c0_5] : memref<1x768x384xbf16, #tpu.memory_space<vmem>>, vector<1x768x384xbf16>
    %4 = vector.shape_cast %3 : vector<1x768x384xbf16> to vector<768x384xbf16>
    %cst = arith.constant dense<0.000000e+00> : vector<64x384xf32>
    %5 = tpu.matmul %2, %4, %cst {dimension_numbers = #tpu.dot_dimension_numbers<[1], [0], [0], [1], [0, 0, 1, 1], [], []>} : vector<64x768xbf16>, vector<768x384xbf16>, vector<64x384xf32> -> vector<64x384xf32>
    %6 = vector.extract_strided_slice %5 {offsets = [0, 0], sizes = [64, 128], strides = [1, 1]} : vector<64x384xf32> to vector<64x128xf32>
    %7 = vector.extract_strided_slice %5 {offsets = [0, 128], sizes = [64, 128], strides = [1, 1]} : vector<64x384xf32> to vector<64x128xf32>
    %c63_i32 = arith.constant 63 : i32
    %8 = tpu.dynamic_rotate %7 by %c63_i32 dim 0 : vector<64x128xf32>, i32 -> vector<64x128xf32>
    %9 = arith.addf %6, %8 : vector<64x128xf32>
    %10 = vector.extract_strided_slice %5 {offsets = [0, 256], sizes = [64, 128], strides = [1, 1]} : vector<64x384xf32> to vector<64x128xf32>
    %c62_i32 = arith.constant 62 : i32
    %11 = tpu.dynamic_rotate %10 by %c62_i32 dim 0 : vector<64x128xf32>, i32 -> vector<64x128xf32>
    %12 = arith.addf %9, %11 : vector<64x128xf32>
    %c0_6 = arith.constant 0 : index
    %c0_7 = arith.constant 0 : index
    %13 = vector.load %arg5[%c0_6, %c0_7] : memref<1x128xf32, #tpu.memory_space<vmem>>, vector<1x128xf32>
    %14 = vector.broadcast %13 : vector<1x128xf32> to vector<64x128xf32>
    %15 = arith.addf %12, %14 : vector<64x128xf32>
    %cst_8 = arith.constant 0.000000e+00 : f32
    %16 = vector.broadcast %cst_8 : f32 to vector<64x128xf32>
    %17 = arith.maximumf %15, %16 : vector<64x128xf32>
    %18 = vector.shape_cast %17 : vector<64x128xf32> to vector<4x16x128xf32>
    %19 = vector.extract_strided_slice %18 {offsets = [0, 0, 0], sizes = [4, 4, 128], strides = [1, 1, 1]} : vector<4x16x128xf32> to vector<4x4x128xf32>
    %c0_9 = arith.constant 0 : index
    %c0_10 = arith.constant 0 : index
    %c0_11 = arith.constant 0 : index
    %c0_12 = arith.constant 0 : index
    %20 = vector.load %arg6[%c0_9, %c0_10, %c0_11, %c0_12] : memref<1x4x4x128xf32, #tpu.memory_space<vmem>>, vector<1x4x4x128xf32>
    %21 = vector.shape_cast %20 : vector<1x4x4x128xf32> to vector<4x4x128xf32>
    %22 = vector.shape_cast %19 : vector<4x4x128xf32> to vector<1x4x4x128xf32>
    tpu.vector_store %arg6[%c0_9, %c0_10, %c0_11, %c0_12], %22 {strides = array<i32>} : memref<1x4x4x128xf32, #tpu.memory_space<vmem>>, vector<1x4x4x128xf32>,
    return
  }
  func.func @transform_0(%arg0: i32, %arg1: i32, %arg2: i32) -> (i32, i32, i32, i32) {
    %c0_i32 = arith.constant 0 : i32
    %c0_i32_0 = arith.constant 0 : i32
    %c0_i32_1 = arith.constant 0 : i32
    return %arg0, %arg1, %c0_i32, %c0_i32_0 : i32, i32, i32, i32
  }
  func.func @transform_1(%arg0: i32, %arg1: i32, %arg2: i32) -> (i32, i32, i32) {
    %c0_i32 = arith.constant 0 : i32
    %c0_i32_0 = arith.constant 0 : i32
    %c0_i32_1 = arith.constant 0 : i32
    return %arg2, %c0_i32, %c0_i32_0 : i32, i32, i32
  }
  func.func @transform_2(%arg0: i32, %arg1: i32, %arg2: i32) -> (i32, i32) {
    %c0_i32 = arith.constant 0 : i32
    %c0_i32_0 = arith.constant 0 : i32
    return %c0_i32, %arg2 : i32, i32
  }
  func.func @transform_3(%arg0: i32, %arg1: i32, %arg2: i32) -> (i32, i32, i32, i32) {
    %c0_i32 = arith.constant 0 : i32
    %c0_i32_0 = arith.constant 0 : i32
    return %arg0, %arg1, %c0_i32, %arg2 : i32, i32, i32, i32
  }
}

</mosaic_0001>

<bundles_post_ra>
// kernel: tpu_custom_call.1
= control target key start
LH: loop header
LB: loop body
LE: loop exit
PB: predicated region body
PF: predicated region fallthrough
CT: control target
= control target key end

     0   :  { %s3681_s0 = inlined_call_operand.hbm [shape: bf16[2,4,16,768], index: 0, kind: input, shape index: {}]   ;;  %s3682_s1 = inlined_call_operand.hbm [shape: bf16[2,768,384], index: 1, kind: input, shape index: {}]   ;;  %s3683_s2 = inlined_call_operand.hbm [shape: f32[1,256], index: 2, kind: input, shape index: {}]   ;;  %s3684_s3 = inlined_call_operand.hbm [shape: f32[2,4,4,256], index: 3, kind: output, shape index: {}]  }
   0x1   :  { %3700 = sst [smem:[#allocation23_spill]] %s3681_s0 }
   0x2   :  { %3701 = sst [smem:[#allocation24_spill]] %s3682_s1 }
   0x3   :  { %3702 = sst [smem:[#allocation25_spill]] %s3684_s3 }
   0x4   :  { %8 = vsyncpa [#allocation3], 0 }
   0x5   :  { %10 = vsyncpa [#allocation3 + $0x1], 0 }
   0x6   :  { %11 = vsyncpa [#allocation6], 0 }
   0x7   :  { %13 = vsyncpa [#allocation6 + $0x1], 0 }
   0x8   :  { %14 = vsyncpa [#allocation4], 0 }
   0x9   :  { %16 = vsyncpa [#allocation4 + $0x1], 0  ;;  %s2973_s12 = smov 0   ;;  %s2975_s13 = smov 0  }
   0xa   :  { %s2977_s14 = smov 0   ;;  %s2979_s15 = smov 0  }
   0xb   :  { %s2981_s16 = smov 0   ;;  %s2983_s17 = smov 0  }
   0xc   :  { %s2985_s18 = smov 0   ;;  %s2987_s19 = smov 0  }
   0xd   :  { %s2989_s20 = smov 0   ;;  %s2991_s21 = smov 0  }
   0xe   :  { %s2993_s22 = smov 0   ;;  %s2995_s23 = smov 0  }
   0xf   :  { %s2997_s24 = smov 0   ;;  %s2999_s25 = smov 0  }
  0x10 LB: > { %3703 = sst [smem:[#allocation12_spill]] %s2888_s12  ;;  %s3042_s26 = sadd.s32 4294967295, %s2940_s25   ;;  %s2940_s25 = sphi %s2999_s25, %s22_s25   ;;  %s2936_s24 = sphi %s2997_s24, %s3760_s24   ;;  %s2932_s23 = sphi %s2995_s23, %s3759_s23   ;;  %s2928_s22 = sphi %s2993_s22, %s3747_s22   ;;  %s2924_s21 = sphi %s2991_s21, %s3758_s21   ;;  %s2920_s20 = sphi %s2989_s20, %s3746_s20   ;;  %s2916_s19 = sphi %s2987_s19, %s3757_s19   ;;  %s2912_s18 = sphi %s2985_s18, %s3756_s18   ;;  %s2908_s17 = sphi %s2983_s17, %s3755_s17   ;;  %s2904_s16 = sphi %s2981_s16, %s3754_s16   ;;  %s2900_s15 = sphi %s2979_s15, %s3753_s15   ;;  %s2896_s14 = sphi %s2977_s14, %s3743_s14   ;;  %s2892_s13 = sphi %s2975_s13, %s3752_s13   ;;  %s2888_s12 = sphi %s2973_s12, %s3751_s12  }
  0x11   : > { %3704 = sst [smem:[#allocation13_spill]] %s2896_s14  ;;  %s34_s27 = sadd.s32 1, %s2932_s23 }
  0x12   : > { %3705 = sst [smem:[#allocation14_spill]] %s2920_s20  ;;  %p3045_p0 = scmp.ge.s32.totalorder %s34_s27, 2 }
  0x13   : > { %3706 = sst [smem:[#allocation15_spill]] %s2924_s21  ;;  %p3690_p1 = scmp.eq.s32.totalorder %s2940_s25, 0 }
  0x14   : > { %3707 = sst [smem:[#allocation16_spill]] %s2928_s22  ;;  %p3689_p2 = scmp.eq.s32.totalorder %s3042_s26, 0 }
  0x15   : > { %3708 = sst [smem:[#allocation17_spill]] %s2936_s24  ;;  %s76_s29 = sadd.s32 1, %s2908_s17 }
  0x16   : > { %s3762_s27 = smov (%p3045_p0, %s34_s27), 0  ;;  %p83_p3 = scmp.ne.s32.totalorder %s2908_s17, %s2904_s16 }
  0x17   : > { %3710 = sst [smem:[#allocation18_spill]] %s3762_s27  ;;  %p89_p4 = scmp.ne.s32.totalorder %s2904_s16, %s2900_s15 }
  0x18   : > { %s3061_s30 = ssub.s32 %s2932_s23, %s3762_s27  ;;  %p85_p7 = por %p83_p3, %p3690_p1 }
  0x19   : > { %p74_p6 = scmp.eq.s32.totalorder %s3061_s30, 0  ;;  %p3069_p8 = por %p89_p4, %p3689_p2 }
  0x1a   : > { %p3688_p9 = scmp.lt.s32.totalorder %s2940_s25, 4  ;;  %s193_s6 = sand.u32 1, %s2940_s25  }
  0x1b   : > { %s3711_s4 = scalar_select %p3069_p8, 1, 0 }
  0x1c   : > { %s3074_s5 = scalar_select %p74_p6, %s2908_s17, %s76_s29  }
  0x1d   : > { %s3686_s7 = sand.u32 1, %s2908_s17   ;;  %p3083_p10 = pnand %p3688_p9, %p85_p7 }
  0x1e   : > { %3712 = sst [smem:[#allocation19_spill]] %s3074_s5  ;;  %s2325_s8 = smul.u32 1152, %s3686_s7 }
  0x1f   : > { %s2326_s10 = smul.u32 18432, %s2932_s23  ;;  %s3714_s1 = sld [smem:[#allocation24_spill]] }
  0x20   : > { %s197_s29 = scalar_lea.vmem [#allocation5], %s2325_s8  ;;  %s3095_s7 = scalar_lea.sflag [#allocation6], %s193_s6 }
  0x21   : > { %s204_s5 = sshll.u32 %s197_s29, 4  ;;  %p3692_p12 = pneg %p3083_p10  ;;  %s3093_s5 = int_to_ptr.vmem [resolvable:$true] %s204_s5 }
  0x25   : > { %s3091_s27 = scalar_lea.hbm %s3714_s1, %s2326_s10  ;;  %s2705_s15 = scalar_lea.hbm %s3714_s1, 36864 }
  0x26   : > { %s2700_s3 = scalar_lea.hbm %s3091_s27, 18432  ;;  %p2706_p4 = scmp.lt.u32.totalorder %s3091_s27, %s3714_s1 }
  0x27   : > { %p2701_p11 = scmp.ne.s32.totalorder %s3091_s27, %s2700_s3  ;;  %p2707_p6 = scmp.lt.u32.totalorder %s2705_s15, %s2700_s3 }
  0x28   : > { %p2709_p9 = scmp.lt.u32.totalorder %s2700_s3, %s3091_s27 }
  0x29   : > { %p2703_p13 = pnand %p3692_p12, %p2701_p11  ;;  %p2708_p7 = por %p2707_p6, %p2706_p4 }
  0x2b   : > { %p2704_p3 = pneg %p2703_p13  ;;  %p2710_p5 = por %p2709_p9, %p2708_p7 }
  0x2d   : > { %p2711_p2 = pnand %p2710_p5, %p2704_p3 }
  0x2f   : > { %2714 = shalt.err (!%p2711_p2)
}
  0x30   : > { %s2715_s6 = scalar_lea.vmem %s3093_s5, 18432  ;;  %s2942_s8 = smov [#allocation5]  }
  0x31   : > { %p2716_p11 = scmp.ne.s32.totalorder %s3093_s5, %s2715_s6  ;;  %s2720_s29 = sshll.u32 %s2942_s8, 4  ;;  %s2721_s29 = int_to_ptr.vmem [resolvable:$false] %s2720_s29 }
  0x32   : > { %s2722_s21 = scalar_lea.vmem %s2721_s29, 36864  ;;  %p2723_p8 = scmp.lt.s32.totalorder %s3093_s5, %s2721_s29 }
  0x33   : > { %p2718_p13 = pnand %p2716_p11, %p3692_p12  ;;  %p2724_p4 = scmp.lt.s32.totalorder %s2722_s21, %s2715_s6 }
  0x35   : > { %p2719_p1 = pneg %p2718_p13  ;;  %p2725_p6 = por %p2724_p4, %p2723_p8 }
  0x37   : > { %p2726_p9 = pnand %p2725_p6, %p2719_p1 }
  0x39   : > { %2729 = shalt.err (!%p2726_p9)
}
  0x3a   : > { %s2943_s3 = smov 192   ;;  %s2944_s22 = smov 12  }
  0x3b   : > { %2343 = dma.hbm_to_vmem [thread:$0]  (!%p3083_p10), %s3091_s27, 18432, %s3093_s5, %s3095_s7, %s2943_s3, %s2943_s3, %s2944_s22  }
  0x3c   : > { %p2011_p1 = scmp.ge.s32.totalorder %s2940_s25, 1  ;;  %p229_p2 = scmp.lt.s32.totalorder %s2940_s25, 5 }
  0x3d   : > { %s2005_s11 = sadd.s32 4294967294, %s2940_s25   ;;  %s41_s15 = sadd.s32 1, %s2936_s24 }
  0x3e   : > { %p3125_p5 = pnand %p2011_p1, %p229_p2  ;;  %s50_s6 = sadd.s32 1, %s2920_s20 }
  0x3f   : > { %s3764_s15 = smov (!%p3045_p0, %s41_s15), %s2936_s24  ;;  %p57_p8 = scmp.ne.s32.totalorder %s2920_s20, %s2916_s19 }
  0x40   : > { %s3715_s10 = scalar_select %p3125_p5, 1, 0 }
  0x41   : > { %p63_p3 = scmp.ne.s32.totalorder %s2916_s19, %s2912_s18  ;;  %p43_p7 = scmp.ge.s32.totalorder %s3764_s15, 2 }
  0x42   : > { %s132_s27 = sadd.s32 1, %s2896_s14  ;;  %p3716_p11 = scmp.eq.s32.totalorder %s2940_s25, 0 }
  0x43   : > { %p3718_p4 = scmp.eq.s32.totalorder %s3042_s26, 0  ;;  %s3766_s15 = smov (%p43_p7, %s3764_s15), 0 }
  0x44   : > { %p3142_p13 = por %p3716_p11, %p57_p8  ;;  %3720 = sst [smem:[#allocation20_spill]] %s3766_s15 }
  0x45   : > { %p3148_p6 = por %p3718_p4, %p63_p3  ;;  %p142_p0 = scmp.ne.s32.totalorder %s2896_s14, %s2892_s13 }
  0x46   : > { %p148_p9 = scmp.ne.s32.totalorder %s2892_s13, %s2888_s12  ;;  %s45_s18 = ssub.s32 %s2936_s24, %s3766_s15 }
  0x47   : > { %s3719_s8 = scalar_select %p3148_p6, 1, 0 }
  0x48   : > { %p149_p1 = scmp.eq.s32.totalorder %s2005_s11, 3  ;;  %p48_p2 = scmp.eq.s32.totalorder %s45_s18, 0 }
  0x49   : > { %s129_s28 = sor.u32 %s3061_s30, %s45_s18  ;;  %p3721_p11 = scmp.eq.s32.totalorder %s3042_s26, 3 }
  0x4a   : > { %p130_p8 = scmp.eq.s32.totalorder %s129_s28, 0  ;;  %p3173_p3 = por %p149_p1, %p148_p9 }
  0x4b   : > { %p3163_p12 = por %p3721_p11, %p142_p0  ;;  %s169_s1 = sand.u32 1, %s2920_s20  }
  0x4c   : > { %s3168_s21 = scalar_select %p48_p2, %s2920_s20, %s50_s6  }
  0x4d   : > { %s3722_s29 = scalar_select %p3163_p12, 1, 0 }
  0x4e   : > { %3723 = sst [smem:[#allocation21_spill]] %s3168_s21  ;;  %s2323_s12 = smul.u32 192, %s169_s1 }
  0x4f   : > { %s3171_s3 = scalar_select %p130_p8, %s2896_s14, %s132_s27  }
  0x50   : > { %s3725_s22 = scalar_select %p3173_p3, 1, 0 }
  0x51   : > { %3724 = sst [smem:[#allocation22_spill]] %s3171_s3  ;;  %s2324_s15 = smul.u32 3072, %s2936_s24 }
  0x52   : > { %p3726_p7 = scmp.lt.s32.totalorder %s2940_s25, 4  ;;  %s3728_s0 = sld [smem:[#allocation23_spill]] }
  0x53   : > { %s173_s27 = scalar_lea.vmem [#allocation2], %s2323_s12  ;;  %s3194_s5 = scalar_lea.sflag [#allocation3], %s169_s1 }
  0x54   : > { %p3183_p4 = pnand %p3726_p7, %p3142_p13  ;;  %s183_s28 = sshll.u32 %s173_s27, 4  ;;  %s3192_s28 = int_to_ptr.vmem [resolvable:$true] %s183_s28 }
  0x56   : > { %p2732_p0 = pneg %p3183_p4 }
  0x58   : > { %s3190_s6 = scalar_lea.hbm %s3728_s0, %s2324_s15  ;;  %s2735_s18 = scalar_lea.hbm %s3728_s0, 6144 }
  0x59   : > { %s2730_s24 = scalar_lea.hbm %s3190_s6, 3072  ;;  %p2736_p2 = scmp.lt.u32.totalorder %s3190_s6, %s3728_s0 }
  0x5a   : > { %p2731_p13 = scmp.ne.s32.totalorder %s3190_s6, %s2730_s24  ;;  %p2737_p8 = scmp.lt.u32.totalorder %s2735_s18, %s2730_s24 }
  0x5b   : > { %p2739_p7 = scmp.lt.u32.totalorder %s2730_s24, %s3190_s6 }
  0x5c   : > { %p2733_p9 = pnand %p2732_p0, %p2731_p13  ;;  %p2738_p11 = por %p2737_p8, %p2736_p2 }
  0x5e   : > { %p2734_p1 = pneg %p2733_p9  ;;  %p2740_p3 = por %p2739_p7, %p2738_p11 }
  0x60   : > { %p2741_p12 = pnand %p2740_p3, %p2734_p1 }
  0x62   : > { %2744 = shalt.err (!%p2741_p12)
}
  0x63   : > { %s2745_s1 = scalar_lea.vmem %s3192_s28, 3072  ;;  %s2945_s12 = smov [#allocation2]  }
  0x64   : > { %p2746_p13 = scmp.ne.s32.totalorder %s3192_s28, %s2745_s1  ;;  %s2750_s27 = sshll.u32 %s2945_s12, 4  ;;  %s2751_s27 = int_to_ptr.vmem [resolvable:$false] %s2750_s27 }
  0x65   : > { %s2752_s20 = scalar_lea.vmem %s2751_s27, 6144  ;;  %p2753_p5 = scmp.lt.s32.totalorder %s3192_s28, %s2751_s27 }
  0x66   : > { %p2748_p9 = pnand %p2746_p13, %p2732_p0  ;;  %p2754_p2 = scmp.lt.s32.totalorder %s2752_s20, %s2745_s1 }
  0x68   : > { %p2749_p6 = pneg %p2748_p9  ;;  %p2755_p8 = por %p2754_p2, %p2753_p5 }
  0x6a   : > { %p2756_p11 = pnand %p2755_p8, %p2749_p6 }
  0x6c   : > { %2759 = shalt.err (!%p2756_p11)
}
  0x6d   : > { %s2946_s24 = smov 384   ;;  %s2947_s21 = smov 24  }
  0x6e   : > { %2340 = dma.hbm_to_vmem [thread:$0]  (!%p3183_p4), %s3190_s6, 3072, %s3192_s28, %s3194_s5, %s2946_s24, %s2946_s24, %s2947_s21  }
  0x6f   : > { %s2010_s15 = sshll.u32 %s2932_s23, 4  ;;  %s3729_s11 = sand.u32 1, %s2908_s17  }
  0x70   : > { %s217_s18 = scalar_lea.vmem [#allocation7], %s3729_s11  ;;  %s222_s20 = scalar_lea.hbm %s3683_s2, %s2010_s15 }
  0x71   : > { %s224_s12 = sshll.u32 %s217_s18, 4  ;;  %s2760_s0 = scalar_lea.hbm %s222_s20, 16  ;;  %s225_s12 = int_to_ptr.vmem [resolvable:$true] %s224_s12 }
  0x72   : > { %p2761_p12 = scmp.ne.s32.totalorder %s222_s20, %s2760_s0  ;;  %p3730_p5 = pneg %p3083_p10 }
  0x73   : > { %s2765_s30 = scalar_lea.hbm %s3683_s2, 32  ;;  %p2766_p4 = scmp.lt.u32.totalorder %s222_s20, %s3683_s2 }
  0x74   : > { %p2763_p6 = pnand %p2761_p12, %p3730_p5  ;;  %p2767_p0 = scmp.lt.u32.totalorder %s2765_s30, %s2760_s0 }
  0x75   : > { %p2769_p7 = scmp.lt.u32.totalorder %s2760_s0, %s222_s20 }
  0x76   : > { %p2764_p3 = pneg %p2763_p6  ;;  %p2768_p1 = por %p2767_p0, %p2766_p4 }
  0x78   : > { %p2770_p13 = por %p2769_p7, %p2768_p1 }
  0x7a   : > { %p2771_p9 = pnand %p2770_p13, %p2764_p3 }
  0x7c   : > { %2774 = shalt.err (!%p2771_p9)
}
  0x7d   : > { %s2775_s5 = scalar_lea.vmem %s225_s12, 16  ;;  %p3731_p8 = pmov %p3730_p5 }
  0x7e   : > { %p2776_p2 = scmp.ne.s32.totalorder %s225_s12, %s2775_s5  ;;  %s2948_s24 = smov [#allocation7]  }
  0x7f   : > { %s2780_s14 = sshll.u32 %s2948_s24, 4  ;;  %s2781_s14 = int_to_ptr.vmem [resolvable:$false] %s2780_s14 }
  0x80   : > { %p2778_p11 = pnand %p2776_p2, %p3731_p8  ;;  %s2782_s3 = scalar_lea.vmem %s2781_s14, 32 }
  0x81   : > { %p2783_p5 = scmp.lt.s32.totalorder %s225_s12, %s2781_s14  ;;  %p2784_p6 = scmp.lt.s32.totalorder %s2782_s3, %s2775_s5 }
  0x82   : > { %p2779_p12 = pneg %p2778_p11 }
  0x83   : > { %p2785_p0 = por %p2784_p6, %p2783_p5 }
  0x85   : > { %p2786_p4 = pnand %p2785_p0, %p2779_p12 }
  0x87   : > { %2789 = shalt.err (!%p2786_p4)
}
  0x88   : > { %2346 = dma.hbm_to_vmem [thread:$0]  (!%p3083_p10), %s222_s20, 16, %s225_s12, %s3095_s7  }
  0x89   : > { %p3732_p3 = scmp.ne.s32.totalorder %s3715_s10, 0 }
  0x8a   : > { %s235_s0 = sand.u32 (!%p3732_p3), 1, %s2916_s19   ;;  %p3733_p1 = scmp.ne.s32.totalorder (!%p3732_p3), %s3719_s8, 0 }
  0x8b   : > { %233 = sbr.rel (%p3732_p3) target bundleno = 566 (0x236), region = 32  ;;  %s236_s15 = scalar_lea.sflag (!%p3732_p3), [#allocation3], %s235_s0 }
  0x8c   : > { %s2327_s21 = smul.u32 (!%p3732_p3), 192, %s235_s0 }
  0x8e   : > { %s3246_s11 = scalar_lea.vmem (!%p3732_p3), [#allocation2], %s2327_s21 }
  0x92   : > { %2875 = dma.done.wait (%p3733_p1), %s236_s15, 3072  }
  0x93   : > { %2877 = vsyncadd (%p3733_p1), %s236_s15, 4294964224  ;;  %s244_s7 = sand.u32 1, %s3042_s26   ;;  %s246_s9 = sand.u32 1, %s2904_s16  }
  0x94   : > { %s2328_s10 = smul.u32 1152, %s246_s9  ;;  %s245_s18 = scalar_lea.sflag [#allocation6], %s244_s7 }
  0x95   : > { %p3734_p10 = scmp.ne.s32.totalorder %s3711_s4, 0 }
  0x96   : > { %s3256_s12 = scalar_lea.vmem [#allocation5], %s2328_s10 }
  0x97   : > { %2879 = dma.done.wait (%p3734_p10), %s245_s18, 18448  }
  0x98   : > { %2881 = vsyncadd (%p3734_p10), %s245_s18, 4294948848  ;;  %v2472_v0 = vld [vmem:[%s3256_s12 + $0x4] ss:$12 sps:$4 sm:$0xff]   ;;  %v2476_v2 = vld [vmem:[%s3256_s12] ss:$12 sps:$4 sm:$0xff]   ;;  %s285_s26 = sand.u32 1, %s2892_s13  }
  0x99   : > { %v2474_v1 = vld [vmem:[%s3256_s12 + $0x184] ss:$12 sps:$4 sm:$0xff]   ;;  %1395 = vmatprep.subr.bf16.mxu0 %v2472_v0  ;;  %v2477_v3 = vld [vmem:[%s3256_s12 + $0x180] ss:$12 sps:$4 sm:$0xff]   ;;  %v2478_v4 = vld [vmem:[%s3256_s12 + $0x1c] ss:$12 sps:$4 sm:$0xff]  }
  0x9a   : > { %1464 = vmatprep.subr.bf16.mxu1 %v2474_v1  ;;  %1396 = vmatpush1.bf16.msra.mxu0 %v2476_v2  ;;  %v2480_v5 = vld [vmem:[%s3256_s12 + $0x19c] ss:$12 sps:$4 sm:$0xff]   ;;  %v2482_v6 = vld [vmem:[%s3256_s12 + $0x18] ss:$12 sps:$4 sm:$0xff]   ;;  %v2484_v8 = vld [vmem:[%s3256_s12 + $0x34] ss:$12 sps:$4 sm:$0xff]  }
  0x9b   : > { %1465 = vmatpush1.bf16.msra.mxu1 %v2477_v3  ;;  %1397 = vmatprep.subr.bf16.mxu0 %v2478_v4  ;;  %v2483_v7 = vld [vmem:[%s3256_s12 + $0x198] ss:$12 sps:$4 sm:$0xff]   ;;  %v2486_v9 = vld [vmem:[%s3256_s12 + $0x1b4] ss:$12 sps:$4 sm:$0xff]   ;;  %v2488_v10 = vld [vmem:[%s3256_s12 + $0x30] ss:$12 sps:$4 sm:$0xff]  }
  0x9c   : > { %1466 = vmatprep.subr.bf16.mxu1 %v2480_v5  ;;  %v2489_v11 = vld [vmem:[%s3256_s12 + $0x1b0] ss:$12 sps:$4 sm:$0xff]   ;;  %v2490_v12 = vld [vmem:[%s3256_s12 + $0x4c] ss:$12 sps:$4 sm:$0xff]   ;;  %v2494_v14 = vld [vmem:[%s3256_s12 + $0x48] ss:$12 sps:$4 sm:$0xff]  }
  0x9d   : > { %v2492_v13 = vld [vmem:[%s3256_s12 + $0x1cc] ss:$12 sps:$4 sm:$0xff]   ;;  %v2495_v15 = vld [vmem:[%s3256_s12 + $0x1c8] ss:$12 sps:$4 sm:$0xff]   ;;  %v2496_v16 = vld [vmem:[%s3256_s12 + $0x64] ss:$12 sps:$4 sm:$0xff]  }
  0x9e   : > { %1398 = vmatpush1.bf16.msra.mxu0 %v2482_v6  ;;  %v2498_v17 = vld [vmem:[%s3256_s12 + $0x1e4] ss:$12 sps:$4 sm:$0xff]   ;;  %v2500_v18 = vld [vmem:[%s3256_s12 + $0x60] ss:$12 sps:$4 sm:$0xff]   ;;  %v2502_v20 = vld [vmem:[%s3256_s12 + $0x7c] ss:$12 sps:$4 sm:$0xff]  }
  0x9f   : > { %1467 = vmatpush1.bf16.msra.mxu1 %v2483_v7  ;;  %1399 = vmatprep.subr.bf16.mxu0 %v2484_v8  ;;  %v2501_v19 = vld [vmem:[%s3256_s12 + $0x1e0] ss:$12 sps:$4 sm:$0xff]   ;;  %v2504_v21 = vld [vmem:[%s3256_s12 + $0x1fc] ss:$12 sps:$4 sm:$0xff]   ;;  %v2506_v22 = vld [vmem:[%s3256_s12 + $0x78] ss:$12 sps:$4 sm:$0xff]  }
  0xa0   : > { %1468 = vmatprep.subr.bf16.mxu1 %v2486_v9  ;;  %v2507_v23 = vld [vmem:[%s3256_s12 + $0x1f8] ss:$12 sps:$4 sm:$0xff]   ;;  %v2508_v24 = vld [vmem:[%s3256_s12 + $0x94] ss:$12 sps:$4 sm:$0xff]   ;;  %v2512_v26 = vld [vmem:[%s3256_s12 + $0x90] ss:$12 sps:$4 sm:$0xff]  }
  0xa1   : > { %v2510_v25 = vld [vmem:[%s3256_s12 + $0x214] ss:$12 sps:$4 sm:$0xff]   ;;  %v2513_v27 = vld [vmem:[%s3256_s12 + $0x210] ss:$12 sps:$4 sm:$0xff]   ;;  %v2514_v28 = vld [vmem:[%s3256_s12 + $0xac] ss:$12 sps:$4 sm:$0xff]  }
  0xa2   : > { %1400 = vmatpush1.bf16.msra.mxu0 %v2488_v10  ;;  %v2516_v29 = vld [vmem:[%s3256_s12 + $0x22c] ss:$12 sps:$4 sm:$0xff]   ;;  %v2518_v30 = vld [vmem:[%s3256_s12 + $0xa8] ss:$12 sps:$4 sm:$0xff]   ;;  %v2520_v32 = vld [vmem:[%s3256_s12 + $0xc4] ss:$12 sps:$4 sm:$0xff]  }
  0xa3   : > { %1469 = vmatpush1.bf16.msra.mxu1 %v2489_v11  ;;  %1401 = vmatprep.subr.bf16.mxu0 %v2490_v12  ;;  %v2519_v31 = vld [vmem:[%s3256_s12 + $0x228] ss:$12 sps:$4 sm:$0xff]   ;;  %v2522_v33 = vld [vmem:[%s3256_s12 + $0x244] ss:$12 sps:$4 sm:$0xff]   ;;  %v2524_v34 = vld [vmem:[%s3256_s12 + $0xc0] ss:$12 sps:$4 sm:$0xff]  }
  0xa4   : > { %1470 = vmatprep.subr.bf16.mxu1 %v2492_v13  ;;  %v2525_v35 = vld [vmem:[%s3256_s12 + $0x240] ss:$12 sps:$4 sm:$0xff]   ;;  %v2526_v36 = vld [vmem:[%s3256_s12 + $0xdc] ss:$12 sps:$4 sm:$0xff]   ;;  %v2530_v38 = vld [vmem:[%s3256_s12 + $0xd8] ss:$12 sps:$4 sm:$0xff]  }
  0xa5   : > { %v2528_v37 = vld [vmem:[%s3256_s12 + $0x25c] ss:$12 sps:$4 sm:$0xff]   ;;  %v2531_v39 = vld [vmem:[%s3256_s12 + $0x258] ss:$12 sps:$4 sm:$0xff]   ;;  %v2532_v40 = vld [vmem:[%s3256_s12 + $0xf4] ss:$12 sps:$4 sm:$0xff]  }
  0xa6   : > { %1402 = vmatpush1.bf16.msra.mxu0 %v2494_v14  ;;  %v2534_v41 = vld [vmem:[%s3256_s12 + $0x274] ss:$12 sps:$4 sm:$0xff]   ;;  %v2536_v42 = vld [vmem:[%s3256_s12 + $0xf0] ss:$12 sps:$4 sm:$0xff]   ;;  %v2538_v44 = vld [vmem:[%s3256_s12 + $0x10c] ss:$12 sps:$4 sm:$0xff]  }
  0xa7   : > { %1471 = vmatpush1.bf16.msra.mxu1 %v2495_v15  ;;  %1403 = vmatprep.subr.bf16.mxu0 %v2496_v16  ;;  %v2537_v43 = vld [vmem:[%s3256_s12 + $0x270] ss:$12 sps:$4 sm:$0xff]   ;;  %v2540_v45 = vld [vmem:[%s3256_s12 + $0x28c] ss:$12 sps:$4 sm:$0xff]   ;;  %v2542_v46 = vld [vmem:[%s3256_s12 + $0x108] ss:$12 sps:$4 sm:$0xff]  }
  0xa8   : > { %1472 = vmatprep.subr.bf16.mxu1 %v2498_v17  ;;  %v2543_v47 = vld [vmem:[%s3256_s12 + $0x288] ss:$12 sps:$4 sm:$0xff]   ;;  %v2544_v48 = vld [vmem:[%s3256_s12 + $0x124] ss:$12 sps:$4 sm:$0xff]   ;;  %v2548_v52 = vld [vmem:[%s3256_s12 + $0x120] ss:$12 sps:$4 sm:$0xff]  }
  0xa9   : > { %v3312_v49 = vld [vmem:[%s3246_s11 + $0x4] ss:$24 sps:$4 sm:$0xff]   ;;  %v2549_v53 = vld [vmem:[%s3256_s12 + $0x2a0] ss:$12 sps:$4 sm:$0xff]   ;;  %v2566_v0 = vld [vmem:[%s3256_s12 + $0x168] ss:$12 sps:$4 sm:$0xff]  }
  0xaa   : > { %1404 = vmatpush1.bf16.msra.mxu0 %v2500_v18  ;;  %v2546_v50 = vld [vmem:[%s3256_s12 + $0x2a4] ss:$12 sps:$4 sm:$0xff]   ;;  %1427 = vmatprep.mubr.bf16.mxu0 %v3312_v49  ;;  %v2550_v54 = vld [vmem:[%s3256_s12 + $0x13c] ss:$12 sps:$4 sm:$0xff]   ;;  %v2556_v58 = vld [vmem:[%s3256_s12 + $0x154] ss:$12 sps:$4 sm:$0xff]  }
  0xab   : > { %1473 = vmatpush1.bf16.msra.mxu1 %v2501_v19  ;;  %1405 = vmatprep.subr.bf16.mxu0 %v2502_v20  ;;  %v3316_v51 = vld [vmem:[%s3246_s11 + $0xc] ss:$24 sps:$4 sm:$0xff]   ;;  %v2552_v55 = vld [vmem:[%s3256_s12 + $0x2bc] ss:$12 sps:$4 sm:$0xff]   ;;  %v2558_v59 = vld [vmem:[%s3256_s12 + $0x2d4] ss:$12 sps:$4 sm:$0xff]  }
  0xac   : > { %1474 = vmatprep.subr.bf16.mxu1 %v2504_v21  ;;  %1496 = vmatprep.mubr.bf16.mxu1 %v3316_v51  ;;  %v2554_v56 = vld [vmem:[%s3256_s12 + $0x138] ss:$12 sps:$4 sm:$0xff]   ;;  %v2560_v60 = vld [vmem:[%s3256_s12 + $0x150] ss:$12 sps:$4 sm:$0xff]   ;;  %v2567_v1 = vld [vmem:[%s3256_s12 + $0x2e8] ss:$12 sps:$4 sm:$0xff]  }
  0xad   : > { %v2555_v57 = vld [vmem:[%s3256_s12 + $0x2b8] ss:$12 sps:$4 sm:$0xff]   ;;  %v2561_v61 = vld [vmem:[%s3256_s12 + $0x2d0] ss:$12 sps:$4 sm:$0xff]   ;;  %v2577_v4 = vld [vmem:[%s3256_s12 + $0xc8] ss:$12 sps:$4 sm:$0xff]  }
  0xae   : > { %1406 = vmatpush1.bf16.msra.mxu0 %v2506_v22  ;;  %v2562_v62 = vld [vmem:[%s3256_s12 + $0x16c] ss:$12 sps:$4 sm:$0xff]   ;;  %v2576_v2 = vld [vmem:[%s3256_s12 + $0x304] ss:$12 sps:$4 sm:$0xff]   ;;  %v3340_v5 = vld [vmem:[%s3246_s11 + $0x8] ss:$24 sps:$4 sm:$0xff]  }
  0xaf   : > { %1475 = vmatpush1.bf16.msra.mxu1 %v2507_v23  ;;  %1407 = vmatprep.subr.bf16.mxu0 %v2508_v24  ;;  %v2564_v63 = vld [vmem:[%s3256_s12 + $0x2ec] ss:$12 sps:$4 sm:$0xff]   ;;  %v2578_v7 = vld [vmem:[%s3256_s12 + $0x8] ss:$12 sps:$4 sm:$0xff]   ;;  %v2590_v18 = vld [vmem:[%s3256_s12 + $0x330] ss:$12 sps:$4 sm:$0xff]  }
  0xb0   : > { %1476 = vmatprep.subr.bf16.mxu1 %v2510_v25  ;;  %v3336_v3 = vld [vmem:[%s3246_s11] ss:$24 sps:$4 sm:$0xff]   ;;  %v2581_v8 = vld [vmem:[%s3256_s12 + $0x31c] ss:$12 sps:$4 sm:$0xff]   ;;  %v3347_v10 = vld [vmem:[%s3246_s11 + $0x34] ss:$24 sps:$4 sm:$0xff]  }
  0xb1   : > { %v2574_v6 = vld [vmem:[%s3256_s12 + $0x300] ss:$12 sps:$4 sm:$0xff]   ;;  %v3350_v11 = vld [vmem:[%s3246_s11 + $0x3c] ss:$24 sps:$4 sm:$0xff]   ;;  %v2579_v12 = vld [vmem:[%s3256_s12 + $0x318] ss:$12 sps:$4 sm:$0xff]  }
  0xb2   : > { %1408 = vmatpush1.bf16.msra.mxu0 %v2512_v26  ;;  %v2582_v9 = vld [vmem:[%s3256_s12 + $0xe0] ss:$12 sps:$4 sm:$0xff]   ;;  %v3358_v15 = vld [vmem:[%s3246_s11 + $0x30] ss:$24 sps:$4 sm:$0xff]   ;;  %v2593_v16 = vld [vmem:[%s3256_s12 + $0xf8] ss:$12 sps:$4 sm:$0xff]  }
  0xb3   : > { %1477 = vmatpush1.bf16.msra.mxu1 %v2513_v27  ;;  %1409 = vmatprep.subr.bf16.mxu0 %v2514_v28  ;;  %v2583_v13 = vld [vmem:[%s3256_s12 + $0x20] ss:$12 sps:$4 sm:$0xff]   ;;  %v3364_v17 = vld [vmem:[%s3246_s11 + $0x38] ss:$24 sps:$4 sm:$0xff]   ;;  %v3371_v22 = vld [vmem:[%s3246_s11 + $0x64] ss:$24 sps:$4 sm:$0xff]  }
  0xb4   : > { %1478 = vmatprep.subr.bf16.mxu1 %v2516_v29  ;;  %v2592_v14 = vld [vmem:[%s3256_s12 + $0x334] ss:$12 sps:$4 sm:$0xff]   ;;  %v2594_v19 = vld [vmem:[%s3256_s12 + $0x38] ss:$12 sps:$4 sm:$0xff]   ;;  %v2598_v21 = vld [vmem:[%s3256_s12 + $0x110] ss:$12 sps:$4 sm:$0xff]  }
  0xb5   : > { %v2597_v20 = vld [vmem:[%s3256_s12 + $0x34c] ss:$12 sps:$4 sm:$0xff]   ;;  %v2595_v24 = vld [vmem:[%s3256_s12 + $0x348] ss:$12 sps:$4 sm:$0xff]   ;;  %v2599_v25 = vld [vmem:[%s3256_s12 + $0x50] ss:$12 sps:$4 sm:$0xff]  }
  0xb6   : > { %1410 = vmatpush1.bf16.msra.mxu0 %v2518_v30  ;;  %v3374_v23 = vld [vmem:[%s3246_s11 + $0x6c] ss:$24 sps:$4 sm:$0xff]   ;;  %v3381_v26 = vld [vmem:[%s3246_s11 + $0x60] ss:$24 sps:$4 sm:$0xff]   ;;  %v2609_v29 = vld [vmem:[%s3256_s12 + $0x128] ss:$12 sps:$4 sm:$0xff]  }
  0xb7   : > { %1479 = vmatpush1.bf16.msra.mxu1 %v2519_v31  ;;  %1411 = vmatprep.subr.bf16.mxu0 %v2520_v32  ;;  %v3384_v27 = vld [vmem:[%s3246_s11 + $0x68] ss:$24 sps:$4 sm:$0xff]   ;;  %v2608_v28 = vld [vmem:[%s3256_s12 + $0x364] ss:$12 sps:$4 sm:$0xff]   ;;  %s256_s4 = scalar_lea.vmem [#allocation7], %s246_s9  ;;  %s3735_s8 = sld [smem:[#allocation16_spill]] }
  0xb8   : > { %1480 = vmatprep.subr.bf16.mxu1 %v2522_v33  ;;  %v2606_v30 = vld [vmem:[%s3256_s12 + $0x360] ss:$12 sps:$4 sm:$0xff]   ;;  %v2610_v31 = vld [vmem:[%s3256_s12 + $0x68] ss:$12 sps:$4 sm:$0xff]   ;;  %s2012_s27 = sshll.u32 %s285_s26, 4  ;;  %s3736_s1 = sld [smem:[#allocation15_spill]] }
  0xb9   : > { %v2613_v32 = vld [vmem:[%s3256_s12 + $0x37c] ss:$12 sps:$4 sm:$0xff]   ;;  %v2614_v33 = vld [vmem:[%s3256_s12 + $0x140] ss:$12 sps:$4 sm:$0xff]   ;;  %s287_s6 = scalar_lea.vmem [#allocation8], %s2012_s27  ;;  %s3737_s3 = sld [smem:[#allocation25_spill]] }
  0xba   : > { %1412 = vmatpush1.bf16.msra.mxu0 %v2524_v34  ;;  %v3395_v34 = vld [vmem:[%s3246_s11 + $0x94] ss:$24 sps:$4 sm:$0xff]   ;;  %s1870_s28 = sshll.u32 %s287_s6, 4  ;;  %s3605_s21 = scalar_lea.sflag [#allocation4], %s285_s26  ;;  %s3596_s28 = int_to_ptr.vmem [resolvable:$true] %s1870_s28 }
  0xbb   : > { %1481 = vmatpush1.bf16.msra.mxu1 %v2525_v35  ;;  %1413 = vmatprep.subr.bf16.mxu0 %v2526_v36  ;;  %v3398_v35 = vld [vmem:[%s3246_s11 + $0x9c] ss:$24 sps:$4 sm:$0xff]   ;;  %v2611_v36 = vld [vmem:[%s3256_s12 + $0x378] ss:$12 sps:$4 sm:$0xff]   ;;  %s2790_s15 = scalar_lea.vmem %s3596_s28, 256  ;;  %p3738_p13 = scmp.ne.s32.totalorder %s3722_s29, 0 }
  0xbc   : > { %1482 = vmatprep.subr.bf16.mxu1 %v2528_v37  ;;  %v2615_v37 = vld [vmem:[%s3256_s12 + $0x80] ss:$12 sps:$4 sm:$0xff]   ;;  %p2791_p7 = scmp.ne.s32.totalorder %s3596_s28, %s2790_s15 }
  0xbd   : > { %s2183_s20 = sshll.u32 %s3735_s8, 3 }
  0xbe   : > { %1414 = vmatpush1.bf16.msra.mxu0 %v2530_v38  ;;  %v2624_v38 = vld [vmem:[%s3256_s12 + $0x394] ss:$12 sps:$4 sm:$0xff]   ;;  %s1867_s30 = sadd.s32 %s3736_s1, %s2183_s20  ;;  %p2792_p9 = pnand %p2791_p7, %p3738_p13 }
  0xbf   : > { %1483 = vmatpush1.bf16.msra.mxu1 %v2531_v39  ;;  %1415 = vmatprep.subr.bf16.mxu0 %v2532_v40  ;;  %v3406_v39 = vld [vmem:[%s3246_s11 + $0x90] ss:$24 sps:$4 sm:$0xff]   ;;  %v2625_v40 = vld [vmem:[%s3256_s12 + $0x158] ss:$12 sps:$4 sm:$0xff]   ;;  %s2184_s5 = sshll.u32 %s1867_s30, 6 }
  0xc0   : > { %1484 = vmatprep.subr.bf16.mxu1 %v2534_v41  ;;  %v3412_v41 = vld [vmem:[%s3246_s11 + $0x98] ss:$24 sps:$4 sm:$0xff]   ;;  %s3601_s0 = scalar_lea.hbm %s3737_s3, %s2184_s5  ;;  %p2793_p2 = pneg %p2792_p9 }
  0xc2   : > { %1416 = vmatpush1.bf16.msra.mxu0 %v2536_v42  ;;  %v2622_v42 = vld [vmem:[%s3256_s12 + $0x390] ss:$12 sps:$4 sm:$0xff]  }
  0xc3   : > { %1485 = vmatpush1.bf16.msra.mxu1 %v2537_v43  ;;  %1417 = vmatprep.subr.bf16.mxu0 %v2538_v44  ;;  %v2626_v43 = vld [vmem:[%s3256_s12 + $0x98] ss:$12 sps:$4 sm:$0xff]  }
  0xc4   : > { %1486 = vmatprep.subr.bf16.mxu1 %v2540_v45  ;;  %v2629_v44 = vld [vmem:[%s3256_s12 + $0x3ac] ss:$12 sps:$4 sm:$0xff]   ;;  %v2630_v45 = vld [vmem:[%s3256_s12 + $0x170] ss:$12 sps:$4 sm:$0xff]  }
  0xc6   : > { %1418 = vmatpush1.bf16.msra.mxu0 %v2542_v46  ;;  %v2627_v46 = vld [vmem:[%s3256_s12 + $0x3a8] ss:$12 sps:$4 sm:$0xff]  }
  0xc7   : > { %1487 = vmatpush1.bf16.msra.mxu1 %v2543_v47  ;;  %1419 = vmatprep.subr.bf16.mxu0 %v2544_v48  ;;  %v2631_v47 = vld [vmem:[%s3256_s12 + $0xb0] ss:$12 sps:$4 sm:$0xff]  }
  0xc8   : > { %1488 = vmatprep.subr.bf16.mxu1 %v2546_v50  ;;  %v2634_v48 = vld [vmem:[%s3256_s12 + $0x3c4] ss:$12 sps:$4 sm:$0xff]   ;;  %v2635_v50 = vld [vmem:[%s3256_s12 + $0x248] ss:$12 sps:$4 sm:$0xff]  }
  0xca   : > { %1420 = vmatpush1.bf16.msra.mxu0 %v2548_v52  ;;  %v2632_v52 = vld [vmem:[%s3256_s12 + $0x3c0] ss:$12 sps:$4 sm:$0xff]  }
  0xcb   : > { %1489 = vmatpush1.bf16.msra.mxu1 %v2549_v53  ;;  %1421 = vmatprep.subr.bf16.mxu0 %v2550_v54  ;;  %v2636_v53 = vld [vmem:[%s3256_s12 + $0x188] ss:$12 sps:$4 sm:$0xff]  }
  0xcc   : > { %1490 = vmatprep.subr.bf16.mxu1 %v2552_v55  ;;  %v2639_v54 = vld [vmem:[%s3256_s12 + $0x3dc] ss:$12 sps:$4 sm:$0xff]   ;;  %v2640_v55 = vld [vmem:[%s3256_s12 + $0x260] ss:$12 sps:$4 sm:$0xff]  }
  0xce   : > { %1422 = vmatpush1.bf16.msra.mxu0 %v2554_v56  ;;  %v2637_v56 = vld [vmem:[%s3256_s12 + $0x3d8] ss:$12 sps:$4 sm:$0xff]  }
  0xcf   : > { %1491 = vmatpush1.bf16.msra.mxu1 %v2555_v57  ;;  %1423 = vmatprep.subr.bf16.mxu0 %v2556_v58  ;;  %v2641_v57 = vld [vmem:[%s3256_s12 + $0x1a0] ss:$12 sps:$4 sm:$0xff]   ;;  %v2645_v58 = vld [vmem:[%s3256_s12 + $0x278] ss:$12 sps:$4 sm:$0xff]  }
  0xd0   : > { %1492 = vmatprep.subr.bf16.mxu1 %v2558_v59  ;;  %v2642_v59 = vld [vmem:[%s3256_s12 + $0x3f0] ss:$12 sps:$4 sm:$0xff]  }
  0xd2   : > { %1424 = vmatpush1.bf16.msra.mxu0 %v2560_v60  ;;  %v2646_v60 = vld [vmem:[%s3256_s12 + $0x1b8] ss:$12 sps:$4 sm:$0xff]  }
  0xd3   : > { %1493 = vmatpush1.bf16.msra.mxu1 %v2561_v61  ;;  %1425 = vmatprep.subr.bf16.mxu0 %v2562_v62  ;;  %v2649_v61 = vld [vmem:[%s3256_s12 + $0x40c] ss:$12 sps:$4 sm:$0xff]   ;;  %v2650_v62 = vld [vmem:[%s3256_s12 + $0x290] ss:$12 sps:$4 sm:$0xff]  }
  0xd4   : > { %1494 = vmatprep.subr.bf16.mxu1 %v2564_v63  ;;  %v2647_v63 = vld [vmem:[%s3256_s12 + $0x408] ss:$12 sps:$4 sm:$0xff]  }
  0xd6   : > { %1426 = vmatpush1.bf16.msra.mxu0 %v2566_v0  ;;  %v2651_v0 = vld [vmem:[%s3256_s12 + $0x1d0] ss:$12 sps:$4 sm:$0xff]  }
  0xd7   : > { %1495 = vmatpush1.bf16.msra.mxu1 %v2567_v1  ;;  %1533 = vmatprep.subr.bf16.mxu0 %v2576_v2  ;;  %v3443_v1 = vld [vmem:[%s3246_s11 + $0x14] ss:$24 sps:$4 sm:$0xff]   ;;  %v2654_v2 = vld [vmem:[%s3256_s12 + $0x424] ss:$12 sps:$4 sm:$0xff]  }
  0xd8   : > { %2187 = vmatprep.subr.bf16.mxu1 %v2577_v4  ;;  %v2652_v4 = vld [vmem:[%s3256_s12 + $0x420] ss:$12 sps:$4 sm:$0xff]  }
  0xd9   : > { %1428 = vmatmul.mubr.bf16.vlgmr.msra.gmra.mrb[0].mxu0 %v3336_v3 }
  0xda   : > { %1497 = vmatmul.mubr.bf16.vlgmr.msra.gmra.mrb[0].mxu1 %v3340_v5  ;;  %1534 = vmatpush1.bf16.msra.mxu0 %v2574_v6  ;;  %v2656_v6 = vld [vmem:[%s3256_s12 + $0x1e8] ss:$12 sps:$4 sm:$0xff]  }
  0xdb   : > { %2188 = vmatpush3.bf16.msra.mxu1 %v2578_v7  ;;  %1535 = vmatprep.subr.bf16.mxu0 %v2581_v8  ;;  %v2659_v7 = vld [vmem:[%s3256_s12 + $0x43c] ss:$12 sps:$4 sm:$0xff]   ;;  %v2660_v8 = vld [vmem:[%s3256_s12 + $0x2c0] ss:$12 sps:$4 sm:$0xff]  }
  0xdc   : > { %2189 = vmatprep.subr.bf16.mxu1 %v2582_v9  ;;  %1436 = vmatprep.mubr.bf16.mxu0 %v3347_v10  ;;  %v2657_v9 = vld [vmem:[%s3256_s12 + $0x438] ss:$12 sps:$4 sm:$0xff]  }
  0xdd   : > { %1505 = vmatprep.mubr.bf16.mxu1 %v3350_v11 }
  0xde   : > { %1536 = vmatpush1.bf16.msra.mxu0 %v2579_v12  ;;  %v2664_v12 = vld [vmem:[%s3256_s12 + $0x454] ss:$12 sps:$4 sm:$0xff]  }
  0xdf   : > { %2190 = vmatpush3.bf16.msra.mxu1 %v2583_v13  ;;  %1537 = vmatprep.subr.bf16.mxu0 %v2592_v14  ;;  %v2665_v13 = vld [vmem:[%s3256_s12 + $0x2d8] ss:$12 sps:$4 sm:$0xff]   ;;  %v2662_v14 = vld [vmem:[%s3256_s12 + $0x450] ss:$12 sps:$4 sm:$0xff]  }
  0xe0   : > { %2191 = vmatprep.subr.bf16.mxu1 %v2593_v16  ;;  %v2669_v16 = vld [vmem:[%s3256_s12 + $0x46c] ss:$12 sps:$4 sm:$0xff]  }
  0xe1   : > { %1437 = vmatmul.mubr.bf16.gmra.mrb[4].mxu0 %v3358_v15 }
  0xe2   : > { %1506 = vmatmul.mubr.bf16.gmra.mrb[4].mxu1 %v3364_v17  ;;  %1538 = vmatpush1.bf16.msra.mxu0 %v2590_v18  ;;  %v2670_v18 = vld [vmem:[%s3256_s12 + $0x2f0] ss:$12 sps:$4 sm:$0xff]  }
  0xe3   : > { %2192 = vmatpush3.bf16.msra.mxu1 %v2594_v19  ;;  %1539 = vmatprep.subr.bf16.mxu0 %v2597_v20  ;;  %v2667_v19 = vld [vmem:[%s3256_s12 + $0x468] ss:$12 sps:$4 sm:$0xff]   ;;  %v2671_v20 = vld [vmem:[%s3256_s12 + $0x230] ss:$12 sps:$4 sm:$0xff]  }
  0xe4   : > { %2193 = vmatprep.subr.bf16.mxu1 %v2598_v21  ;;  %1445 = vmatprep.mubr.bf16.mxu0 %v3371_v22  ;;  %v2675_v21 = vld [vmem:[%s3256_s12 + $0x3c8] ss:$12 sps:$4 sm:$0xff]  }
  0xe5   : > { %1514 = vmatprep.mubr.bf16.mxu1 %v3374_v23 }
  0xe6   : > { %1540 = vmatpush1.bf16.msra.mxu0 %v2595_v24  ;;  %v2676_v24 = vld [vmem:[%s3256_s12 + $0x308] ss:$12 sps:$4 sm:$0xff]  }
  0xe7   : > { %2194 = vmatpush3.bf16.msra.mxu1 %v2599_v25  ;;  %1541 = vmatprep.subr.bf16.mxu0 %v2608_v28  ;;  %v2677_v25 = vld [vmem:[%s3256_s12 + $0x3e0] ss:$12 sps:$4 sm:$0xff]   ;;  %v2682_v28 = vld [vmem:[%s3256_s12 + $0x3f8] ss:$12 sps:$4 sm:$0xff]  }
  0xe8   : > { %2195 = vmatprep.subr.bf16.mxu1 %v2609_v29  ;;  %v2681_v29 = vld [vmem:[%s3246_s11 + $0x40] ss:$24 sps:$4 sm:$0xff]  }
  0xe9   : > { %1446 = vmatmul.mubr.bf16.gmra.mrb[8].mxu0 %v3381_v26 }
  0xea   : > { %1515 = vmatmul.mubr.bf16.gmra.mrb[8].mxu1 %v3384_v27  ;;  %1542 = vmatpush1.bf16.msra.mxu0 %v2606_v30  ;;  %v2683_v30 = vld [vmem:[%s3256_s12 + $0x338] ss:$12 sps:$4 sm:$0xff]  }
  0xeb   : > { %2196 = vmatpush3.bf16.msra.mxu1 %v2610_v31  ;;  %1543 = vmatprep.subr.bf16.mxu0 %v2613_v32  ;;  %v2686_v31 = vld [vmem:[%s3246_s11 + $0x74] ss:$24 sps:$4 sm:$0xff]   ;;  %v2685_v32 = vld [vmem:[%s3256_s12 + $0x350] ss:$12 sps:$4 sm:$0xff]  }
  0xec   : > { %2197 = vmatprep.subr.bf16.mxu1 %v2614_v33  ;;  %1454 = vmatprep.mubr.bf16.mxu0 %v3395_v34  ;;  %v2688_v33 = vld [vmem:[%s3246_s11 + $0x70] ss:$24 sps:$4 sm:$0xff]  }
  0xed   : > { %1523 = vmatprep.mubr.bf16.mxu1 %v3398_v35 }
  0xee   : > { %1544 = vmatpush1.bf16.msra.mxu0 %v2611_v36  ;;  %v2693_v36 = vld [vmem:[%s3246_s11 + $0xa4] ss:$24 sps:$4 sm:$0xff]  }
  0xef   : > { %2198 = vmatpush3.bf16.msra.mxu1 %v2615_v37  ;;  %1545 = vmatprep.subr.bf16.mxu0 %v2624_v38  ;;  %v2692_v37 = vld [vmem:[%s3256_s12 + $0x380] ss:$12 sps:$4 sm:$0xff]  }
  0xf0   : > { %2199 = vmatprep.subr.bf16.mxu1 %v2625_v40  ;;  %v2695_v38 = vld [vmem:[%s3246_s11 + $0xa0] ss:$24 sps:$4 sm:$0xff]   ;;  %v2698_v40 = vld [vmem:[%s3256_s12 + $0x470] ss:$12 sps:$4 sm:$0xff]  }
  0xf1   : > { %1455 = vmatmul.mubr.bf16.gmra.mrb[12].mxu0 %v3406_v39 }
  0xf2   : > { %1524 = vmatmul.mubr.bf16.gmra.mrb[12].mxu1 %v3412_v41  ;;  %1546 = vmatpush1.bf16.msra.mxu0 %v2622_v42 }
  0xf3   : > { %2200 = vmatpush3.bf16.msra.mxu1 %v2626_v43  ;;  %1547 = vmatprep.subr.bf16.mxu0 %v2629_v44 }
  0xf4   : > { %2201 = vmatprep.subr.bf16.mxu1 %v2630_v45  ;;  %1634 = vmatprep.mubr.bf16.mxu1 %v3312_v49  ;;  %v2644_v49 = vld [vmem:[%s3256_s12 + $0x3f4] ss:$12 sps:$4 sm:$0xff]  }
  0xf5   : > { %1565 = vmatprep.mubr.bf16.mxu0 %v3443_v1 }
  0xf6   : > { %1548 = vmatpush1.bf16.msra.mxu0 %v2627_v46 }
  0xf7   : > { %2202 = vmatpush3.bf16.msra.mxu1 %v2631_v47  ;;  %1549 = vmatprep.subr.bf16.mxu0 %v2634_v48 }
  0xf8   : > { %2227 = vmatprep.subr.bf16.mxu1 %v2635_v50 }
  0xfa   : > { %1635 = vmatmul.mubr.bf16.vlgmr.msra.gmra.mrb[16].mxu1 %v3336_v3  ;;  %1550 = vmatpush1.bf16.msra.mxu0 %v2632_v52  ;;  %v2655_v3 = vld [vmem:[%s3256_s12 + $0x2a8] ss:$12 sps:$4 sm:$0xff]  }
  0xfb   : > { %2228 = vmatpush3.bf16.msra.mxu1 %v2636_v53  ;;  %1551 = vmatprep.subr.bf16.mxu0 %v2639_v54 }
  0xfc   : > { %2229 = vmatprep.subr.bf16.mxu1 %v2640_v55  ;;  %1642 = vmatprep.mubr.bf16.mxu1 %v3347_v10  ;;  %v2661_v10 = vld [vmem:[%s3256_s12 + $0x200] ss:$12 sps:$4 sm:$0xff]  }
  0xfe   : > { %1552 = vmatpush1.bf16.msra.mxu0 %v2637_v56 }
  0xff   : > { %2230 = vmatpush3.bf16.msra.mxu1 %v2641_v57  ;;  %1553 = vmatprep.subr.bf16.mxu0 %v2644_v49 }
 0x100   : > { %2231 = vmatprep.subr.bf16.mxu1 %v2645_v58 }
 0x102   : > { %1643 = vmatmul.mubr.bf16.gmra.mrb[20].mxu1 %v3358_v15  ;;  %1554 = vmatpush1.bf16.msra.mxu0 %v2642_v59  ;;  %v2666_v15 = vld [vmem:[%s3256_s12 + $0x218] ss:$12 sps:$4 sm:$0xff]  }
 0x103   : > { %2232 = vmatpush3.bf16.msra.mxu1 %v2646_v60  ;;  %1555 = vmatprep.subr.bf16.mxu0 %v2649_v61 }
 0x104   : > { %2233 = vmatprep.subr.bf16.mxu1 %v2650_v62  ;;  %1650 = vmatprep.mubr.bf16.mxu1 %v3371_v22  ;;  %v3469_v22 = vld [vmem:[%s3246_s11 + $0x10] ss:$24 sps:$4 sm:$0xff]  }
 0x106   : > { %1556 = vmatpush1.bf16.msra.mxu0 %v2647_v63 }
 0x107   : > { %2234 = vmatpush3.bf16.msra.mxu1 %v2651_v0  ;;  %1557 = vmatprep.subr.bf16.mxu0 %v2654_v2 }
 0x108   : > { %2235 = vmatprep.subr.bf16.mxu1 %v2655_v3 }
 0x10a   : > { %1651 = vmatmul.mubr.bf16.gmra.mrb[24].mxu1 %v3381_v26  ;;  %1558 = vmatpush1.bf16.msra.mxu0 %v2652_v4  ;;  %v3474_v26 = vld [vmem:[%s3246_s11 + $0x44] ss:$24 sps:$4 sm:$0xff]   ;;  %s2949_s11 = smov [#allocation8]  }
 0x10b   : > { %2236 = vmatpush3.bf16.msra.mxu1 %v2656_v6  ;;  %1559 = vmatprep.subr.bf16.mxu0 %v2659_v7  ;;  %s2794_s7 = sshll.u32 %s2949_s11, 4  ;;  %s2795_s7 = int_to_ptr.vmem [resolvable:$false] %s2794_s7 }
 0x10c   : > { %2237 = vmatprep.subr.bf16.mxu1 %v2660_v8  ;;  %1658 = vmatprep.mubr.bf16.mxu1 %v3395_v34  ;;  %v2690_v34 = vld [vmem:[%s3256_s12 + $0x368] ss:$12 sps:$4 sm:$0xff]   ;;  %s2796_s9 = scalar_lea.vmem %s2795_s7, 512  ;;  %p2797_p8 = scmp.lt.s32.totalorder %s3596_s28, %s2795_s7 }
 0x10d   : > { %p2798_p11 = scmp.lt.s32.totalorder %s2796_s9, %s2790_s15 }
 0x10e   : > { %1560 = vmatpush1.bf16.msra.mxu0 %v2657_v9 }
 0x10f   : > { %2238 = vmatpush3.bf16.msra.mxu1 %v2661_v10  ;;  %1561 = vmatprep.subr.bf16.mxu0 %v2664_v12  ;;  %p2799_p12 = por %p2798_p11, %p2797_p8 }
 0x110   : > { %2239 = vmatprep.subr.bf16.mxu1 %v2665_v13 }
 0x111   : > { %p2800_p5 = pnand %p2799_p12, %p2793_p2 }
 0x112   : > { %1659 = vmatmul.mubr.bf16.gmra.mrb[28].mxu1 %v3406_v39  ;;  %1562 = vmatpush1.bf16.msra.mxu0 %v2662_v14  ;;  %v2697_v39 = vld [vmem:[%s3256_s12 + $0x398] ss:$12 sps:$4 sm:$0xff]  }
 0x113   : > { %2240 = vmatpush3.bf16.msra.mxu1 %v2666_v15  ;;  %1563 = vmatprep.subr.bf16.mxu0 %v2669_v16 }
 0x114   : > { %2241 = vmatprep.subr.bf16.mxu1 %v2670_v18  ;;  %1699 = vmatprep.mubr.bf16.mxu1 %v3316_v51  ;;  %v2678_v51 = vld [vmem:[%s3256_s12 + $0x320] ss:$12 sps:$4 sm:$0xff]  }
 0x116   : > { %1564 = vmatpush1.bf16.msra.mxu0 %v2667_v19 }
 0x117   : > { %2242 = vmatpush3.bf16.msra.mxu1 %v2671_v20  ;;  %2267 = vmatprep.subr.bf16.mxu0 %v2675_v21 }
 0x118   : > { %2307 = vmatprep.subr.bf16.mxu1 %v2675_v21 }
 0x119   : > { %1566 = vmatmul.mubr.bf16.vlgmr.msra.gmra.mrb[16].mxu0 %v3469_v22 }
 0x11a   : > { %1700 = vmatmul.mubr.bf16.vlgmr.msra.gmra.mrb[32].mxu1 %v3340_v5  ;;  %2268 = vmatpush3.bf16.msra.mxu0 %v2676_v24  ;;  %v2684_v5 = vld [vmem:[%s3256_s12 + $0x410] ss:$12 sps:$4 sm:$0xff]  }
 0x11b   : > { %2315 = vmatpush3.bf16.msra.mxu1 %v2676_v24  ;;  %2269 = vmatprep.subr.bf16.mxu0 %v2677_v25 }
 0x11c   : > { %2308 = vmatprep.subr.bf16.mxu1 %v2677_v25  ;;  %1574 = vmatprep.mubr.bf16.mxu0 %v3474_v26 }
 0x11d   : > { %1707 = vmatprep.mubr.bf16.mxu1 %v3350_v11  ;;  %v2689_v11 = vld [vmem:[%s3256_s12 + $0x428] ss:$12 sps:$4 sm:$0xff]  }
 0x11e   : > { %2270 = vmatpush3.bf16.msra.mxu0 %v2678_v51 }
 0x11f   : > { %2316 = vmatpush3.bf16.msra.mxu1 %v2678_v51  ;;  %2271 = vmatprep.subr.bf16.mxu0 %v2682_v28 }
 0x120   : > { %2309 = vmatprep.subr.bf16.mxu1 %v2682_v28 }
 0x121   : > { %1575 = vmatmul.mubr.bf16.gmra.mrb[20].mxu0 %v2681_v29 }
 0x122   : > { %1708 = vmatmul.mubr.bf16.gmra.mrb[36].mxu1 %v3364_v17  ;;  %2272 = vmatpush3.bf16.msra.mxu0 %v2683_v30  ;;  %v2691_v17 = vld [vmem:[%s3256_s12 + $0x440] ss:$12 sps:$4 sm:$0xff]  }
 0x123   : > { %2317 = vmatpush3.bf16.msra.mxu1 %v2683_v30  ;;  %2273 = vmatprep.subr.bf16.mxu0 %v2684_v5 }
 0x124   : > { %2310 = vmatprep.subr.bf16.mxu1 %v2684_v5  ;;  %1583 = vmatprep.mubr.bf16.mxu0 %v2686_v31 }
 0x125   : > { %1715 = vmatprep.mubr.bf16.mxu1 %v3374_v23  ;;  %v2696_v23 = vld [vmem:[%s3256_s12 + $0x458] ss:$12 sps:$4 sm:$0xff]  }
 0x126   : > { %2274 = vmatpush3.bf16.msra.mxu0 %v2685_v32 }
 0x127   : > { %2318 = vmatpush3.bf16.msra.mxu1 %v2685_v32  ;;  %2275 = vmatprep.subr.bf16.mxu0 %v2689_v11 }
 0x128   : > { %2311 = vmatprep.subr.bf16.mxu1 %v2689_v11 }
 0x129   : > { %1584 = vmatmul.mubr.bf16.gmra.mrb[24].mxu0 %v2688_v33 }
 0x12a   : > { %1716 = vmatmul.mubr.bf16.gmra.mrb[40].mxu1 %v3384_v27  ;;  %2276 = vmatpush3.bf16.msra.mxu0 %v2690_v34  ;;  %v2699_v27 = vld [vmem:[%s3256_s12 + $0x3b0] ss:$12 sps:$4 sm:$0xff]  }
 0x12b   : > { %2319 = vmatpush3.bf16.msra.mxu1 %v2690_v34  ;;  %2277 = vmatprep.subr.bf16.mxu0 %v2691_v17 }
 0x12c   : > { %2312 = vmatprep.subr.bf16.mxu1 %v2691_v17  ;;  %1592 = vmatprep.mubr.bf16.mxu0 %v2693_v36 }
 0x12d   : > { %1723 = vmatprep.mubr.bf16.mxu1 %v3398_v35 }
 0x12e   : > { %2278 = vmatpush3.bf16.msra.mxu0 %v2692_v37 }
 0x12f   : > { %2320 = vmatpush3.bf16.msra.mxu1 %v2692_v37  ;;  %2279 = vmatprep.subr.bf16.mxu0 %v2696_v23 }
 0x130   : > { %2313 = vmatprep.subr.bf16.mxu1 %v2696_v23 }
 0x131   : > { %1593 = vmatmul.mubr.bf16.gmra.mrb[28].mxu0 %v2695_v38 }
 0x132   : > { %1724 = vmatmul.mubr.bf16.gmra.mrb[44].mxu1 %v3412_v41  ;;  %2280 = vmatpush3.bf16.msra.mxu0 %v2697_v39 }
 0x133   : > { %2321 = vmatpush3.bf16.msra.mxu1 %v2697_v39  ;;  %2281 = vmatprep.subr.bf16.mxu0 %v2698_v40 }
 0x134   : > { %2314 = vmatprep.subr.bf16.mxu1 %v2698_v40  ;;  %1764 = vmatprep.mubr.bf16.mxu0 %v3443_v1 }
 0x135   : > { %1780 = vmatprep.mubr.bf16.mxu1 %v2686_v31 }
 0x136   : > { %2282 = vmatpush3.bf16.msra.mxu0 %v2699_v27 }
 0x137   : > { %2322 = vmatpush3.bf16.msra.mxu1 %v2699_v27 }
 0x139   : > { %1765 = vmatmul.mubr.bf16.vlgmr.msra.gmra.mrb[32].mxu0 %v3469_v22 }
 0x13a   : > { %1781 = vmatmul.mubr.bf16.vlgmr.msra.gmra.mrb[48].mxu1 %v2688_v33  ;;  %1772 = vmatprep.mubr.bf16.mxu0 %v3474_v26 }
 0x13b   : > { %1788 = vmatprep.mubr.bf16.mxu1 %v2693_v36 }
 0x141   : > { %1773 = vmatmul.mubr.bf16.gmra.mrb[36].mxu0 %v2681_v29 }
 0x142   : > { %1789 = vmatmul.mubr.bf16.gmra.mrb[52].mxu1 %v2695_v38 }
 0x1ac   : > { %v1429_v35 = vpop.f32.mrb[0].mxu0 }
 0x1ad   : > { %v1498_v41 = vpop.f32.mrb[0].mxu1  ;;  %v1431_v43 = vpop.f32.mrb[1].mxu0 }
 0x1ae   : > { %v3506_v42 = vadd.f32 %v1498_v41, %v1429_v35  ;;  %v1500_v44 = vpop.f32.mrb[1].mxu1  ;;  %v1433_v46 = vpop.f32.mrb[2].mxu0 }
 0x1af   : > { %v3508_v45 = vadd.f32 %v1500_v44, %v1431_v43  ;;  %v1502_v47 = vpop.f32.mrb[2].mxu1  ;;  %v1434_v48 = vpop.f32.mrb[3].mxu0  ;;  %v1805_v46 = vlaneseq }
 0x1b0   : > { %v1503_v50 = vpop.f32.mrb[3].mxu1 }
 0x1b1   : > { %v3510_v52 = vadd.f32 %v1503_v50, %v1434_v48 }
 0x1b4   : > { %v1438_v53 = vpop.f32.mrb[4].mxu0 }
 0x1b5   : > { %v1507_v54 = vpop.f32.mrb[4].mxu1  ;;  %v1440_v56 = vpop.f32.mrb[5].mxu0 }
 0x1b6   : > { %v3512_v55 = vadd.f32 %v1507_v54, %v1438_v53  ;;  %v1509_v57 = vpop.f32.mrb[5].mxu1  ;;  %v1442_v58 = vpop.f32.mrb[6].mxu0 }
 0x1b7   : > { %v3514_v49 = vadd.f32 %v1509_v57, %v1440_v56  ;;  %v1511_v59 = vpop.f32.mrb[6].mxu1  ;;  %v1443_v60 = vpop.f32.mrb[7].mxu0  ;;  %v3537_v56 = vshrl.u32 %v1805_v46, 7 }
 0x1b8   : > { %v1512_v61 = vpop.f32.mrb[7].mxu1 }
 0x1b9   : > { %v3516_v62 = vadd.f32 %v1512_v61, %v1443_v60  ;;  %vm1807_vm0 = vcmp.lt.s32.totalorder %v3537_v56, 7  ;;  %vm1824_vm1 = vcmp.lt.s32.totalorder %v3537_v56, 6 }
 0x1bc   : > { %v1447_v63 = vpop.f32.mrb[8].mxu0 }
 0x1bd   : > { %v1516_v0 = vpop.f32.mrb[8].mxu1  ;;  %v1449_v2 = vpop.f32.mrb[9].mxu0 }
 0x1be   : > { %v3518_v1 = vadd.f32 %v1516_v0, %v1447_v63  ;;  %v1518_v3 = vpop.f32.mrb[9].mxu1  ;;  %v1451_v6 = vpop.f32.mrb[10].mxu0 }
 0x1bf   : > { %v3520_v4 = vadd.f32 %v1518_v3, %v1449_v2  ;;  %v1520_v7 = vpop.f32.mrb[10].mxu1  ;;  %v1452_v8 = vpop.f32.mrb[11].mxu0 }
 0x1c0   : > { %v1521_v9 = vpop.f32.mrb[11].mxu1 }
 0x1c1   : > { %v3522_v10 = vadd.f32 %v1521_v9, %v1452_v8 }
 0x1c4   : > { %v1456_v12 = vpop.f32.mrb[12].mxu0 }
 0x1c5   : > { %v1525_v13 = vpop.f32.mrb[12].mxu1  ;;  %v1458_v15 = vpop.f32.mrb[13].mxu0 }
 0x1c6   : > { %v3524_v14 = vadd.f32 %v1525_v13, %v1456_v12  ;;  %v1527_v16 = vpop.f32.mrb[13].mxu1  ;;  %v1460_v19 = vpop.f32.mrb[14].mxu0 }
 0x1c7   : > { %v3526_v18 = vadd.f32 %v1527_v16, %v1458_v15  ;;  %v1529_v20 = vpop.f32.mrb[14].mxu1  ;;  %v1461_v21 = vpop.f32.mrb[15].mxu0 }
 0x1c8   : > { %v1530_v22 = vpop.f32.mrb[15].mxu1 }
 0x1c9   : > { %v3528_v24 = vadd.f32 %v1530_v22, %v1461_v21 }
 0x1cd   : > { %v2203_v25 = vpop.f32.mrb[16].mxu1 }
 0x1ce   : > { %v2204_v26 = vpop.f32.mrb[17].mxu1 }
 0x1cf   : > { %v2205_v51 = vadd.f32 %v2204_v26, %v2203_v25  ;;  %v2206_v28 = vpop.f32.mrb[18].mxu1 }
 0x1d0   : > { %v2207_v29 = vpop.f32.mrb[19].mxu1 }
 0x1d1   : > { %v2208_v30 = vadd.f32 %v2207_v29, %v2206_v28 }
 0x1d5   : > { %v2209_v5 = vpop.f32.mrb[20].mxu1 }
 0x1d6   : > { %v2210_v31 = vpop.f32.mrb[21].mxu1 }
 0x1d7   : > { %v2211_v32 = vadd.f32 %v2210_v31, %v2209_v5  ;;  %v2212_v11 = vpop.f32.mrb[22].mxu1 }
 0x1d8   : > { %v2213_v33 = vpop.f32.mrb[23].mxu1 }
 0x1d9   : > { %v2214_v34 = vadd.f32 %v2213_v33, %v2212_v11 }
 0x1dd   : > { %v2215_v17 = vpop.f32.mrb[24].mxu1 }
 0x1de   : > { %v2216_v36 = vpop.f32.mrb[25].mxu1 }
 0x1df   : > { %v2217_v37 = vadd.f32 %v2216_v36, %v2215_v17  ;;  %v2218_v23 = vpop.f32.mrb[26].mxu1 }
 0x1e0   : > { %v2219_v38 = vpop.f32.mrb[27].mxu1 }
 0x1e1   : > { %v3530_v39 = vadd.f32 %v2219_v38, %v2218_v23 }
 0x1e5   : > { %v2221_v40 = vpop.f32.mrb[28].mxu1 }
 0x1e6   : > { %v2222_v27 = vpop.f32.mrb[29].mxu1 }
 0x1e7   : > { %v3532_v35 = vadd.f32 %v2222_v27, %v2221_v40  ;;  %v2224_v41 = vpop.f32.mrb[30].mxu1 }
 0x1e8   : > { %v2225_v43 = vpop.f32.mrb[31].mxu1 }
 0x1e9   : > { %v3534_v44 = vadd.f32 %v2225_v43, %v2224_v41 }
 0x1ec   : > { %v1567_v47 = vpop.f32.mrb[16].mxu0 }
 0x1ed   : > { %v2243_v48 = vpop.f32.mrb[32].mxu1  ;;  %v1568_v50 = vadd.f32 %v1567_v47, %v3506_v42  ;;  %v1569_v53 = vpop.f32.mrb[17].mxu0 }
 0x1ee   : > { %v2244_v54 = vpop.f32.mrb[33].mxu1  ;;  %v1570_v57 = vadd.f32 %v1569_v53, %v3508_v45  ;;  %v1571_v59 = vpop.f32.mrb[18].mxu0 }
 0x1ef   : > { %v2245_v58 = vadd.f32 %v2244_v54, %v2243_v48  ;;  %v2246_v60 = vpop.f32.mrb[34].mxu1  ;;  %v1572_v61 = vpop.f32.mrb[19].mxu0 }
 0x1f0   : > { %v2247_v63 = vpop.f32.mrb[35].mxu1  ;;  %v1573_v2 = vadd.f32 %v1572_v61, %v3510_v52  ;;  %v1797_v6 = vrot.slane %v1570_v57, 1 }
 0x1f1   : > { %v3540_v0 = vadd.f32 %v2245_v58, %v2205_v51  ;;  %v2248_v3 = vadd.f32 %v2247_v63, %v2246_v60 }
 0x1f2   : > { %v1798_v42 = vrot.slane %v1573_v2, 1 }
 0x1f3   : > { %v3544_v7 = vadd.f32 %v2248_v3, %v2208_v30 }
 0x1f4   : > { %v1811_v8 = vsel %vm1807_vm0, %v1797_v6, %v1798_v42  ;;  %v1576_v45 = vpop.f32.mrb[20].mxu0 }
 0x1f5   : > { %v2249_v9 = vpop.f32.mrb[36].mxu1  ;;  %v3548_v12 = vadd.f32 %v1811_v8, %v1568_v50  ;;  %v1577_v13 = vadd.f32 %v1576_v45, %v3512_v55  ;;  %v1578_v15 = vpop.f32.mrb[21].mxu0 }
 0x1f6   : > { %v2250_v16 = vpop.f32.mrb[37].mxu1  ;;  %v1579_v52 = vadd.f32 %v1578_v15, %v3514_v49  ;;  %v1580_v20 = vpop.f32.mrb[22].mxu0 }
 0x1f7   : > { %v2251_v19 = vadd.f32 %v2250_v16, %v2249_v9  ;;  %v2252_v21 = vpop.f32.mrb[38].mxu1  ;;  %v1581_v22 = vpop.f32.mrb[23].mxu0 }
 0x1f8   : > { %v2253_v25 = vpop.f32.mrb[39].mxu1  ;;  %v1582_v51 = vadd.f32 %v1581_v22, %v3516_v62  ;;  %v1799_v29 = vrot.slane %v1579_v52, 1 }
 0x1f9   : > { %v3552_v26 = vadd.f32 %v2251_v19, %v2211_v32  ;;  %v2254_v28 = vadd.f32 %v2253_v25, %v2252_v21 }
 0x1fa   : > { %v1800_v30 = vrot.slane %v1582_v51, 1 }
 0x1fb   : > { %v3555_v5 = vadd.f32 %v2254_v28, %v2214_v34 }
 0x1fc   : > { %v1810_v55 = vsel %vm1807_vm0, %v1799_v29, %v1800_v30  ;;  %v1585_v31 = vpop.f32.mrb[24].mxu0 }
 0x1fd   : > { %v2255_v11 = vpop.f32.mrb[40].mxu1  ;;  %v3559_v49 = vadd.f32 %v1810_v55, %v1577_v13  ;;  %v1586_v33 = vadd.f32 %v1585_v31, %v3518_v1  ;;  %v1587_v17 = vpop.f32.mrb[25].mxu0 }
 0x1fe   : > { %v2256_v36 = vpop.f32.mrb[41].mxu1  ;;  %v1588_v32 = vadd.f32 %v1587_v17, %v3520_v4  ;;  %v1589_v62 = vpop.f32.mrb[26].mxu0 }
 0x1ff   : > { %v2257_v23 = vadd.f32 %v2256_v36, %v2255_v11  ;;  %v2258_v38 = vpop.f32.mrb[42].mxu1  ;;  %v1590_v40 = vpop.f32.mrb[27].mxu0 }
 0x200   : > { %v2259_v27 = vpop.f32.mrb[43].mxu1  ;;  %v1591_v41 = vadd.f32 %v1590_v40, %v3522_v10  ;;  %v1801_v46 = vrot.slane %v1588_v32, 1  ;;  %v2181_v32 = vld [vmem:[%s256_s4] ss:$0 sm:$0xff] }
 0x201   : > { %v1718_v34 = vadd.f32 %v2257_v23, %v2217_v37  ;;  %v2260_v43 = vadd.f32 %v2259_v27, %v2258_v38 }
 0x202   : > { %v1802_v47 = vrot.slane %v1591_v41, 1 }
 0x203   : > { %v1721_v48 = vadd.f32 %v2260_v43, %v3530_v39 }
 0x204   : > { %v1809_v1 = vsel %vm1807_vm0, %v1801_v46, %v1802_v47  ;;  %v1594_v50 = vpop.f32.mrb[28].mxu0 }
 0x205   : > { %v2261_v53 = vpop.f32.mrb[44].mxu1  ;;  %v1814_v54 = vadd.f32 %v1809_v1, %v1586_v33  ;;  %v1595_v4 = vadd.f32 %v1594_v50, %v3524_v14  ;;  %v1596_v57 = vpop.f32.mrb[29].mxu0 }
 0x206   : > { %v2262_v58 = vpop.f32.mrb[45].mxu1  ;;  %v1597_v59 = vadd.f32 %v1596_v57, %v3526_v18  ;;  %v1598_v60 = vpop.f32.mrb[30].mxu0 }
 0x207   : > { %v2263_v37 = vadd.f32 %v2262_v58, %v2261_v53  ;;  %v2264_v10 = vpop.f32.mrb[46].mxu1  ;;  %v1599_v61 = vpop.f32.mrb[31].mxu0 }
 0x208   : > { %v2265_v63 = vpop.f32.mrb[47].mxu1  ;;  %v1600_v39 = vadd.f32 %v1599_v61, %v3528_v24  ;;  %v1803_v6 = vrot.slane %v1597_v59, 1 }
 0x209   : > { %v1726_v2 = vadd.f32 %v2263_v37, %v3532_v35  ;;  %v2266_v3 = vadd.f32 %v2265_v63, %v2264_v10 }
 0x20a   : > { %v1804_v42 = vrot.slane %v1600_v39, 1 }
 0x20b   : > { %v1729_v8 = vadd.f32 %v2266_v3, %v3534_v44 }
 0x20c   : > { %v1808_v14 = vsel %vm1807_vm0, %v1803_v6, %v1804_v42  ;;  %v2283_v45 = vpop.f32.mrb[32].mxu0 }
 0x20d   : > { %v2295_v9 = vpop.f32.mrb[48].mxu1  ;;  %v1815_v18 = vadd.f32 %v1808_v14, %v1595_v4  ;;  %v2284_v13 = vpop.f32.mrb[33].mxu0 }
 0x20e   : > { %v2296_v15 = vpop.f32.mrb[49].mxu1  ;;  %v2285_v16 = vadd.f32 %v2284_v13, %v2283_v45  ;;  %v2286_v19 = vpop.f32.mrb[34].mxu0 }
 0x20f   : > { %v2297_v52 = vadd.f32 %v2296_v15, %v2295_v9  ;;  %v2298_v35 = vpop.f32.mrb[50].mxu1  ;;  %v2287_v20 = vpop.f32.mrb[35].mxu0 }
 0x210   : > { %v2299_v24 = vpop.f32.mrb[51].mxu1  ;;  %v1767_v21 = vadd.f32 %v2285_v16, %v3540_v0  ;;  %v2288_v44 = vadd.f32 %v2287_v20, %v2286_v19 }
 0x211   : > { %v1783_v22 = vadd.f32 %v2297_v52, %v1718_v34  ;;  %v2300_v25 = vadd.f32 %v2299_v24, %v2298_v35 }
 0x212   : > { %v1770_v51 = vadd.f32 %v2288_v44, %v3544_v7  ;;  %v1816_v29 = vrot.slane %v1767_v21, 2 }
 0x213   : > { %v1786_v28 = vadd.f32 %v2300_v25, %v1721_v48  ;;  %v1820_v30 = vrot.slane %v1783_v22, 2 }
 0x214   : > { %v1817_v55 = vrot.slane %v1770_v51, 2  ;;  %v2289_v11 = vpop.f32.mrb[36].mxu0 }
 0x215   : > { %v1821_v31 = vrot.slane %v1786_v28, 2  ;;  %v2301_v33 = vpop.f32.mrb[52].mxu1  ;;  %v2290_v17 = vpop.f32.mrb[37].mxu0 }
 0x216   : > { %v2302_v36 = vpop.f32.mrb[53].mxu1  ;;  %v1828_v0 = vsel %vm1824_vm1, %v1816_v29, %v1817_v55  ;;  %v2291_v23 = vadd.f32 %v2290_v17, %v2289_v11  ;;  %v2292_v38 = vpop.f32.mrb[38].mxu0 }
 0x217   : > { %v1826_v7 = vsel %vm1824_vm1, %v1820_v30, %v1821_v31  ;;  %v2303_v62 = vadd.f32 %v2302_v36, %v2301_v33  ;;  %v2304_v40 = vpop.f32.mrb[54].mxu1  ;;  %v1829_v27 = vadd.f32 %v1828_v0, %v3548_v12  ;;  %v2293_v41 = vpop.f32.mrb[39].mxu0 }
 0x218   : > { %v1831_v34 = vadd.f32 %v1826_v7, %v1814_v54  ;;  %v2305_v43 = vpop.f32.mrb[55].mxu1  ;;  %v1775_v46 = vadd.f32 %v2291_v23, %v3552_v26  ;;  %v2294_v48 = vadd.f32 %v2293_v41, %v2292_v38 }
 0x219   : > { %v1791_v47 = vadd.f32 %v2303_v62, %v1726_v2  ;;  %v2306_v1 = vadd.f32 %v2305_v43, %v2304_v40  ;;  %v1840_v50 = vadd.f32 %v2181_v32, %v1829_v27 }
 0x21a   : > { %v1842_v53 = vadd.f32 %v2181_v32, %v1831_v34  ;;  %v1778_v4 = vadd.f32 %v2294_v48, %v3555_v5  ;;  %v1818_v37 = vrot.slane %v1775_v46, 2 }
 0x21b   : > { %v1794_v57 = vadd.f32 %v2306_v1, %v1729_v8  ;;  %v1844_v58 = vmax.f32 %v1840_v50, 0.0  ;;  %v1822_v60 = vrot.slane %v1791_v47, 2 }
 0x21c   : > { %v1846_v59 = vmax.f32 %v1842_v53, 0.0  ;;  %v1819_v12 = vrot.slane %v1778_v4, 2 }
 0x21d   : > { %v1823_v54 = vrot.slane %v1794_v57, 2  ;;  %1848 = vst [vmem:[%s287_s6] sm:$0xf] %v1844_v58 }
 0x21e   : > { %1850 = vst [vmem:[%s287_s6 + $0x8] sm:$0xf] %v1846_v59  ;;  %v1827_v26 = vsel %vm1824_vm1, %v1818_v37, %v1819_v12 }
 0x21f   : > { %v1825_v5 = vsel %vm1824_vm1, %v1822_v60, %v1823_v54  ;;  %v1830_v10 = vadd.f32 %v1827_v26, %v3559_v49 }
 0x220   : > { %v1832_v61 = vadd.f32 %v1825_v5, %v1815_v18 }
 0x221   : > { %v1841_v63 = vadd.f32 %v2181_v32, %v1830_v10 }
 0x222   : > { %v1843_v2 = vadd.f32 %v2181_v32, %v1832_v61 }
 0x223   : > { %v1845_v39 = vmax.f32 %v1841_v63, 0.0 }
 0x224   : > { %v1847_v56 = vmax.f32 %v1843_v2, 0.0 }
 0x225   : > { %1849 = vst [vmem:[%s287_s6 + $0x4] sm:$0xf] %v1845_v39 }
 0x226   : > { %1851 = vst [vmem:[%s287_s6 + $0xc] sm:$0xf] %v1847_v56 }
 0x227   : > { %2803 = shalt.err (!%p2800_p5)
}
 0x228   : > { %s2804_s10 = scalar_lea.hbm %s3601_s0, 256  ;;  %s2808_s26 = scalar_lea.hbm %s3737_s3, 1024 }
 0x229   : > { %p2805_p6 = scmp.ne.s32.totalorder %s3601_s0, %s2804_s10  ;;  %p2809_p3 = scmp.lt.u32.totalorder %s3601_s0, %s3737_s3 }
 0x22a   : > { %p2810_p1 = scmp.lt.u32.totalorder %s2808_s26, %s2804_s10  ;;  %p2812_p7 = scmp.lt.u32.totalorder %s2804_s10, %s3601_s0 }
 0x22b   : > { %p2806_p0 = pnand %p2805_p6, %p3738_p13 }
 0x22c   : > { %p2811_p10 = por %p2810_p1, %p2809_p3 }
 0x22d   : > { %p2807_p4 = pneg %p2806_p0 }
 0x22e   : > { %p2813_p9 = por %p2812_p7, %p2811_p10 }
 0x230   : > { %p2814_p2 = pnand %p2813_p9, %p2807_p4 }
 0x232   : > { %2817 = shalt.err (!%p2814_p2)
}
 0x233   : > { %s2950_s27 = smov 64   ;;  %s2951_s1 = smov 128  }
 0x234   : > { %s2952_s20 = smov 4  }
 0x235   : > { %2335 = dma.vmem_to_hbm [thread:$0]  (%p3738_p13), %s3596_s28, 256, %s3601_s0, %s3605_s21, %s2950_s27, %s2951_s1, %s2952_s20  }
 0x236 PF: > { %s3739_s30 = sld [smem:[#allocation12_spill]]  ;;  %p2352_p8 = scmp.ge.s32.totalorder %s2940_s25, 2 }
 0x237   : > { %p3740_p11 = scmp.ne.s32.totalorder %s3725_s22, 0 }
 0x239   : > { %p2348_p12 = pnand %p2352_p8, %p3740_p11 }
 0x23c   : > { %s1885_s6 = sand.u32 1, %s3739_s30  }
 0x23d   : > { %s1886_s5 = scalar_lea.sflag [#allocation4], %s1885_s6 }
 0x23e   : > { %2883 = dma.done.wait (!%p2348_p12), %s1886_s5, 256  }
 0x23f   : > { %2885 = vsyncadd (!%p2348_p12), %s1886_s5, 4294967040  ;;  %s22_s25 = sadd.s32 1, %s2940_s25   ;;  %s3742_s29 = sld [smem:[#allocation13_spill]] }
 0x240   : > { %p3634_p5 = scmp.ge.s32.totalorder %s22_s25, 6   ;;  %s3743_s14 = sld [smem:[#allocation22_spill]] }
 0x241   : > { %s3744_s28 = sld [smem:[#allocation19_spill]]  ;;  %s3745_s0 = sld [smem:[#allocation14_spill]] }
 0x242   : > { %s3746_s20 = sld [smem:[#allocation21_spill]]  ;;  %s3747_s22 = sld [smem:[#allocation17_spill]] }
 0x243   : > { %s3748_s11 = sld [smem:[#allocation18_spill]]  ;;  %s3749_s7 = sld [smem:[#allocation20_spill]] }
 0x244   : > { %s3751_s12 = smov %s2892_s13  ;;  %s3753_s15 = smov %s2904_s16 }
 0x245   : > { %s3752_s13 = smov %s3742_s29  ;;  %s3754_s16 = smov %s2908_s17 }
 0x246   : > { %s3756_s18 = smov %s2916_s19  ;;  %s3758_s21 = smov %s2932_s23 }
 0x247   : > { %s3755_s17 = smov %s3744_s28  ;;  %s3757_s19 = smov %s3745_s0 }
 0x248   :  { %21 = sbr.rel (!%p3634_p5) target bundleno = 16 (0x10), region = 101 }
 0x249   : > { %s3759_s23 = smov %s3748_s11  ;;  %s3760_s24 = smov %s3749_s7 }
 0x24f   :  { %1891 = vsyncpa [#allocation3], 1 }
 0x250   :  { %1893 = vsyncpa [#allocation3 + $0x1], 1 }
 0x251   :  { %1894 = vsyncpa [#allocation6], 1 }
 0x252   :  { %1896 = vsyncpa [#allocation6 + $0x1], 1 }
 0x253   :  { %1897 = vsyncpa [#allocation4], 1 }
 0x254   :  { %1899 = vsyncpa [#allocation4 + $0x1], 1 }

</bundles_post_ra>
